<compile_context>
chip_gen: v7x
topology: tpu7x:2x2x1
jax: 0.10.0
libtpu: 0.0.40
codegen_flags: <defaults>
</compile_context>

<pallas_src>
import math

import jax
import jax.numpy as jnp
from jax.experimental import pallas as pl
from jax.experimental.pallas import tpu as pltpu

# ---------------- model config (tiny BERT-like encoder) --------------------------------
VOCAB = 64
MAX_POS = 32
HIDDEN = 32
HEADS = 2
HEAD_DIM = HIDDEN // HEADS
FFN = 64
LAYERS = 2
NUM_CLASSES = 10
CLS_PAD = 128          # lane-dense padded classifier width
EPS = 1e-12


# ---------------- fused per-(sequence, layer) kernel ------------------------------------
def _encoder_step_kernel(
    x_ref,        # (S, HIDDEN)            f32  embedded tokens of this sequence
    kbias_ref,    # (1, 1, S)              f32  additive key-padding bias (0 / -1e9)
    eg_ref,       # (1, HIDDEN)            f32  embedding LN gamma
    eb_ref,       # (1, HIDDEN)            f32  embedding LN beta
    wqkv_ref,     # (1, HIDDEN, 3*HIDDEN)  bf16 (Q columns pre-scaled by 1/sqrt(Dh))
    bqkv_ref,     # (1, 1, 3*HIDDEN)       f32
    wo_ref,       # (1, HIDDEN, HIDDEN)    bf16
    bo_ref,       # (1, 1, HIDDEN)         f32
    ln1g_ref,     # (1, 1, HIDDEN)         f32
    ln1b_ref,     # (1, 1, HIDDEN)         f32
    w1_ref,       # (1, HIDDEN, FFN)       bf16
    b1_ref,       # (1, 1, FFN)            f32
    w2_ref,       # (1, FFN, HIDDEN)       bf16
    b2_ref,       # (1, 1, HIDDEN)         f32
    ln2g_ref,     # (1, 1, HIDDEN)         f32
    ln2b_ref,     # (1, 1, HIDDEN)         f32
    clsw_ref,     # (HIDDEN, CLS_PAD)      bf16 (zero-padded beyond NUM_CLASSES)
    clsb_ref,     # (1, CLS_PAD)           f32
    out_ref,      # (S, CLS_PAD)           f32
    h_scratch,    # (S, HIDDEN)            f32  activation carried across layer steps
):
    layer = pl.program_id(1)

    def layernorm(h, g, b):
        mu = jnp.mean(h, axis=-1, keepdims=True)
        var = jnp.mean(jnp.square(h - mu), axis=-1, keepdims=True)
        return (h - mu) * jax.lax.rsqrt(var + EPS) * g + b

    def gelu(z):
        # tanh-approx GELU (HF "gelu_new"-style), fp32 VPU/EUP work
        c = jnp.float32(math.sqrt(2.0 / math.pi))
        return 0.5 * z * (1.0 + jnp.tanh(c * (z + 0.044715 * z * z * z)))

    @pl.when(layer == 0)
    def _():
        # Embedding LayerNorm initializes the carried activation for this sequence.
        h_scratch[...] = layernorm(x_ref[...], eg_ref[...], eb_ref[...])

    h = h_scratch[...]                                  # (S, HIDDEN) fp32
    kb = kbias_ref[0]                                   # (1, S) fp32, broadcasts over rows

    # ---- fused QKV projection: bf16 operands, fp32 accumulation ----
    qkv = jnp.dot(h.astype(jnp.bfloat16), wqkv_ref[0],
                  preferred_element_type=jnp.float32) + bqkv_ref[0]   # (S, 3*HIDDEN) f32

    # ---- multi-head attention (scale pre-folded into Q weights) ----
    ctxs = []
    for hh in range(HEADS):
        q = qkv[:, hh * HEAD_DIM:(hh + 1) * HEAD_DIM]
        k = qkv[:, HIDDEN + hh * HEAD_DIM: HIDDEN + (hh + 1) * HEAD_DIM]
        v = qkv[:, 2 * HIDDEN + hh * HEAD_DIM: 2 * HIDDEN + (hh + 1) * HEAD_DIM]

        s = jax.lax.dot_general(
            q.astype(jnp.bfloat16), k.astype(jnp.bfloat16),
            (((1,), (1,)), ((), ())),
            preferred_element_type=jnp.float32)                       # (S, S) f32
        s = s + kb                                                    # key padding bias
        s = s - jnp.max(s, axis=-1, keepdims=True)                    # guards all-padded rows
        p = jnp.exp(s)
        p = p * pl.reciprocal(jnp.sum(p, axis=-1, keepdims=True), approx=True)
        ctxs.append(jnp.dot(p.astype(jnp.bfloat16), v.astype(jnp.bfloat16),
                            preferred_element_type=jnp.float32))      # (S, HEAD_DIM)

    # single output projection over the concatenated head contexts
    ctx = jnp.concatenate(ctxs, axis=-1)                              # (S, HIDDEN)
    attn = jnp.dot(ctx.astype(jnp.bfloat16), wo_ref[0],
                   preferred_element_type=jnp.float32) + bo_ref[0]
    h = layernorm(h + attn, ln1g_ref[0], ln1b_ref[0])

    # ---- feed-forward with fused bias/GELU/residual/LN epilogues ----
    ff = jnp.dot(h.astype(jnp.bfloat16), w1_ref[0],
                 preferred_element_type=jnp.float32) + b1_ref[0]
    ff = gelu(ff)
    ff = jnp.dot(ff.astype(jnp.bfloat16), w2_ref[0],
                 preferred_element_type=jnp.float32) + b2_ref[0]
    h = layernorm(h + ff, ln2g_ref[0], ln2b_ref[0])
    h_scratch[...] = h

    @pl.when(layer == LAYERS - 1)
    def _():
        # classifier into a lane-dense padded slab; unmasked stores
        out_ref[...] = (
            jnp.dot(h.astype(jnp.bfloat16), clsw_ref[...],
                    preferred_element_type=jnp.float32) + clsb_ref[...]
        )


# ---------------- parameter init (deterministic, synthetic) -----------------------------
def init_params(key):
    def nrm(k, shape, scale=0.02):
        return scale * jax.random.normal(k, shape, dtype=jnp.float32)

    keys = iter(jax.random.split(key, 8))

    wqkv = nrm(next(keys), (LAYERS, HIDDEN, 3 * HIDDEN))
    # fold the 1/sqrt(HEAD_DIM) attention scale into the Q columns (and Q bias)
    q_scale = 1.0 / math.sqrt(HEAD_DIM)
    wqkv = wqkv.at[:, :, :HIDDEN].multiply(q_scale)
    bqkv = jnp.zeros((LAYERS, 1, 3 * HIDDEN), jnp.float32)
    bqkv = bqkv.at[:, :, :HIDDEN].multiply(q_scale)   # no-op on zeros; kept for generality

    cls_w = nrm(next(keys), (HIDDEN, NUM_CLASSES))
    cls_w = jnp.pad(cls_w, ((0, 0), (0, CLS_PAD - NUM_CLASSES)))

    params = {
        "word_emb": nrm(next(keys), (VOCAB, HIDDEN)),
        "pos_emb": nrm(next(keys), (MAX_POS, HIDDEN)),
        "emb_ln_g": jnp.ones((1, HIDDEN), jnp.float32),
        "emb_ln_b": jnp.zeros((1, HIDDEN), jnp.float32),
        # matmul weights stored bf16 (MXU-native); biases / LN params stay fp32
        "wqkv": wqkv.astype(jnp.bfloat16),
        "bqkv": bqkv,
        "wo": nrm(next(keys), (LAYERS, HIDDEN, HIDDEN)).astype(jnp.bfloat16),
        "bo": jnp.zeros((LAYERS, 1, HIDDEN), jnp.float32),
        "ln1_g": jnp.ones((LAYERS, 1, HIDDEN), jnp.float32),
        "ln1_b": jnp.zeros((LAYERS, 1, HIDDEN), jnp.float32),
        "w1": nrm(next(keys), (LAYERS, HIDDEN, FFN)).astype(jnp.bfloat16),
        "b1": jnp.zeros((LAYERS, 1, FFN), jnp.float32),
        "w2": nrm(next(keys), (LAYERS, FFN, HIDDEN)).astype(jnp.bfloat16),
        "b2": jnp.zeros((LAYERS, 1, HIDDEN), jnp.float32),
        "ln2_g": jnp.ones((LAYERS, 1, HIDDEN), jnp.float32),
        "ln2_b": jnp.zeros((LAYERS, 1, HIDDEN), jnp.float32),
        "cls_w": cls_w.astype(jnp.bfloat16),
        "cls_b": jnp.zeros((1, CLS_PAD), jnp.float32),
    }
    return params


# ---------------- forward pass -----------------------------------------------------------
def forward(params, input_ids, attention_mask):
    """Token-classification forward. Returns logits [B, S, NUM_CLASSES]."""
    B, S = input_ids.shape
    assert S <= MAX_POS

    # embeddings (glue: gather in plain JAX)
    word = jnp.take(params["word_emb"], input_ids, axis=0)           # [B, S, H]
    pos = params["pos_emb"][:S][None, :, :]                          # [1, S, H]
    x = (word + pos).reshape(B * S, HIDDEN).astype(jnp.float32)

    # O(B*S) per-key additive padding bias (0 keep / -1e9 drop).  Cross-batch masking
    # is implicit: the grid is parallel over batch, each grid step only ever sees its
    # own sequence's keys.
    key_bias = ((attention_mask.astype(jnp.float32) - 1.0) * 1e9).reshape(B, 1, S)

    lw = lambda b, l: (l, 0, 0)       # per-layer weight blocks
    shared2 = lambda b, l: (0, 0)     # layer-independent 2-D params

    out = pl.pallas_call(
        _encoder_step_kernel,
        out_shape=jax.ShapeDtypeStruct((B * S, CLS_PAD), jnp.float32),
        grid_spec=pltpu.PrefetchScalarGridSpec(
            num_scalar_prefetch=0,
            grid=(B, LAYERS),
            in_specs=[
                pl.BlockSpec((S, HIDDEN), lambda b, l: (b, 0)),            # x
                pl.BlockSpec((1, 1, S), lambda b, l: (b, 0, 0)),           # key_bias
                pl.BlockSpec((1, HIDDEN), shared2),                        # emb_ln_g
                pl.BlockSpec((1, HIDDEN), shared2),                        # emb_ln_b
                pl.BlockSpec((1, HIDDEN, 3 * HIDDEN), lw),                 # wqkv
                pl.BlockSpec((1, 1, 3 * HIDDEN), lw),                      # bqkv
                pl.BlockSpec((1, HIDDEN, HIDDEN), lw),                     # wo
                pl.BlockSpec((1, 1, HIDDEN), lw),                          # bo
                pl.BlockSpec((1, 1, HIDDEN), lw),                          # ln1_g
                pl.BlockSpec((1, 1, HIDDEN), lw),                          # ln1_b
                pl.BlockSpec((1, HIDDEN, FFN), lw),                        # w1
                pl.BlockSpec((1, 1, FFN), lw),                             # b1
                pl.BlockSpec((1, FFN, HIDDEN), lw),                        # w2
                pl.BlockSpec((1, 1, HIDDEN), lw),                          # b2
                pl.BlockSpec((1, 1, HIDDEN), lw),                          # ln2_g
                pl.BlockSpec((1, 1, HIDDEN), lw),                          # ln2_b
                pl.BlockSpec((HIDDEN, CLS_PAD), shared2),                  # cls_w
                pl.BlockSpec((1, CLS_PAD), shared2),                       # cls_b
            ],
            out_specs=pl.BlockSpec((S, CLS_PAD), lambda b, l: (b, 0)),
            scratch_shapes=[pltpu.VMEM((S, HIDDEN), jnp.float32)],
        ),
        compiler_params=pltpu.CompilerParams(
            dimension_semantics=("parallel", "arbitrary"),
            vmem_limit_bytes=32 * 1024 * 1024,   # safe on v5e/v6e/v7x scoped VMEM
        ),
    )(
        x, key_bias,
        params["emb_ln_g"], params["emb_ln_b"],
        params["wqkv"], params["bqkv"],
        params["wo"], params["bo"],
        params["ln1_g"], params["ln1_b"],
        params["w1"], params["b1"],
        params["w2"], params["b2"],
        params["ln2_g"], params["ln2_b"],
        params["cls_w"], params["cls_b"],
    )
    return out[:, :NUM_CLASSES].reshape(B, S, NUM_CLASSES)


# ---------------- main --------------------------------------------------------------------
if __name__ == "__main__":
    key = jax.random.PRNGKey(0)
    pkey, ikey = jax.random.split(key)
    params = init_params(pkey)

    B, S = 2, 8
    input_ids = jax.random.randint(ikey, (B, S), 0, VOCAB, dtype=jnp.int32)
    # last two tokens of the second sequence are padding
    attention_mask = jnp.array(
        [[1] * S, [1] * (S - 2) + [0, 0]], dtype=jnp.int32)

    x = {"input_ids": input_ids, "attention_mask": attention_mask}
    logits = forward(params, x["input_ids"], x["attention_mask"])
    jax.block_until_ready(logits)

    assert logits.shape == (B, S, NUM_CLASSES)
    assert logits.dtype == jnp.float32
    assert bool(jnp.all(jnp.isfinite(logits)))
    print("KERNEL_OK")
</pallas_src>

<mosaic_0001>
module attributes {stable_mosaic.version = 11 : i64} {
  func.func @_encoder_step_kernel(%arg0: i32, %arg1: i32, %arg2: memref<8x32xf32, #tpu.memory_space<vmem>>, %arg3: memref<1x1x8xf32, #tpu.memory_space<vmem>>, %arg4: memref<1x32xf32, #tpu.memory_space<vmem>>, %arg5: memref<1x32xf32, #tpu.memory_space<vmem>>, %arg6: memref<1x32x96xbf16, #tpu.memory_space<vmem>>, %arg7: memref<1x1x96xf32, #tpu.memory_space<vmem>>, %arg8: memref<1x32x32xbf16, #tpu.memory_space<vmem>>, %arg9: memref<1x1x32xf32, #tpu.memory_space<vmem>>, %arg10: memref<1x1x32xf32, #tpu.memory_space<vmem>>, %arg11: memref<1x1x32xf32, #tpu.memory_space<vmem>>, %arg12: memref<1x32x64xbf16, #tpu.memory_space<vmem>>, %arg13: memref<1x1x64xf32, #tpu.memory_space<vmem>>, %arg14: memref<1x64x32xbf16, #tpu.memory_space<vmem>>, %arg15: memref<1x1x32xf32, #tpu.memory_space<vmem>>, %arg16: memref<1x1x32xf32, #tpu.memory_space<vmem>>, %arg17: memref<1x1x32xf32, #tpu.memory_space<vmem>>, %arg18: memref<32x128xbf16, #tpu.memory_space<vmem>>, %arg19: memref<1x128xf32, #tpu.memory_space<vmem>>, %arg20: memref<8x128xf32, #tpu.memory_space<vmem>>, %arg21: memref<8x32xf32, #tpu.memory_space<vmem>>) attributes {dimension_semantics = [#tpu.dimension_semantics<parallel>, #tpu.dimension_semantics<arbitrary>], iteration_bounds = array<i64: 2, 2>, scalar_prefetch = 0 : i64, scratch_operands = 1 : i64, tpu.core_type = #tpu.core_type<tc>, window_params = [{transform_indices = @transform_0, window_bounds = array<i64: 8, 32>}, {transform_indices = @transform_1, window_bounds = array<i64: 1, 1, 8>}, {pipeline_mode = #tpu.pipeline_mode<synchronous>, transform_indices = @transform_2, window_bounds = array<i64: 1, 32>}, {pipeline_mode = #tpu.pipeline_mode<synchronous>, transform_indices = @transform_3, window_bounds = array<i64: 1, 32>}, {transform_indices = @transform_4, window_bounds = array<i64: 1, 32, 96>}, {transform_indices = @transform_5, window_bounds = array<i64: 1, 1, 96>}, {transform_indices = @transform_6, window_bounds = array<i64: 1, 32, 32>}, {transform_indices = @transform_7, window_bounds = array<i64: 1, 1, 32>}, {transform_indices = @transform_8, window_bounds = array<i64: 1, 1, 32>}, {transform_indices = @transform_9, window_bounds = array<i64: 1, 1, 32>}, {transform_indices = @transform_10, window_bounds = array<i64: 1, 32, 64>}, {transform_indices = @transform_11, window_bounds = array<i64: 1, 1, 64>}, {transform_indices = @transform_12, window_bounds = array<i64: 1, 64, 32>}, {transform_indices = @transform_13, window_bounds = array<i64: 1, 1, 32>}, {transform_indices = @transform_14, window_bounds = array<i64: 1, 1, 32>}, {transform_indices = @transform_15, window_bounds = array<i64: 1, 1, 32>}, {pipeline_mode = #tpu.pipeline_mode<synchronous>, transform_indices = @transform_16, window_bounds = array<i64: 32, 128>}, {pipeline_mode = #tpu.pipeline_mode<synchronous>, transform_indices = @transform_17, window_bounds = array<i64: 1, 128>}, {transform_indices = @transform_18, window_bounds = array<i64: 8, 128>}]} {
    %c0_i32 = arith.constant 0 : i32
    %0 = arith.cmpi eq, %arg1, %c0_i32 : i32
    %1 = arith.extui %0 : i1 to i32
    %c0_i32_0 = arith.constant 0 : i32
    %2 = arith.cmpi ne, %1, %c0_i32_0 : i32
    scf.if %2 {
      %c0_69 = arith.constant 0 : index
      %c0_70 = arith.constant 0 : index
      %152 = vector.load %arg2[%c0_69, %c0_70] : memref<8x32xf32, #tpu.memory_space<vmem>>, vector<8x32xf32>
      %c0_71 = arith.constant 0 : index
      %c0_72 = arith.constant 0 : index
      %153 = vector.load %arg4[%c0_71, %c0_72] : memref<1x32xf32, #tpu.memory_space<vmem>>, vector<1x32xf32>
      %c0_73 = arith.constant 0 : index
      %c0_74 = arith.constant 0 : index
      %154 = vector.load %arg5[%c0_73, %c0_74] : memref<1x32xf32, #tpu.memory_space<vmem>>, vector<1x32xf32>
      %cst_75 = arith.constant dense<0.000000e+00> : vector<8xf32>
      %155 = vector.multi_reduction <add>, %152, %cst_75 [1] : vector<8x32xf32> to vector<8xf32>
      %156 = vector.shape_cast %155 : vector<8xf32> to vector<8x1xf32>
      %cst_76 = arith.constant 3.200000e+01 : f32
      %157 = vector.broadcast %cst_76 : f32 to vector<8x1xf32>
      %158 = arith.divf %156, %157 : vector<8x1xf32>
      %159 = vector.broadcast %158 : vector<8x1xf32> to vector<8x32xf32>
      %160 = arith.subf %152, %159 : vector<8x32xf32>
      %161 = arith.mulf %160, %160 : vector<8x32xf32>
      %cst_77 = arith.constant dense<0.000000e+00> : vector<8xf32>
      %162 = vector.multi_reduction <add>, %161, %cst_77 [1] : vector<8x32xf32> to vector<8xf32>
      %163 = vector.shape_cast %162 : vector<8xf32> to vector<8x1xf32>
      %cst_78 = arith.constant 3.200000e+01 : f32
      %164 = vector.broadcast %cst_78 : f32 to vector<8x1xf32>
      %165 = arith.divf %163, %164 : vector<8x1xf32>
      %166 = vector.broadcast %158 : vector<8x1xf32> to vector<8x32xf32>
      %167 = arith.subf %152, %166 : vector<8x32xf32>
      %cst_79 = arith.constant 9.99999996E-13 : f32
      %168 = vector.broadcast %cst_79 : f32 to vector<8x1xf32>
      %169 = arith.addf %165, %168 : vector<8x1xf32>
      %170 = math.rsqrt %169 : vector<8x1xf32>
      %171 = vector.broadcast %170 : vector<8x1xf32> to vector<8x32xf32>
      %172 = arith.mulf %167, %171 : vector<8x32xf32>
      %173 = vector.broadcast %153 : vector<1x32xf32> to vector<8x32xf32>
      %174 = arith.mulf %172, %173 : vector<8x32xf32>
      %175 = vector.broadcast %154 : vector<1x32xf32> to vector<8x32xf32>
      %176 = arith.addf %174, %175 : vector<8x32xf32>
      %c0_80 = arith.constant 0 : index
      %c0_81 = arith.constant 0 : index
      %177 = vector.load %arg21[%c0_80, %c0_81] : memref<8x32xf32, #tpu.memory_space<vmem>>, vector<8x32xf32>
      tpu.vector_store %arg21[%c0_80, %c0_81], %176 {strides = array<i32>} : memref<8x32xf32, #tpu.memory_space<vmem>>, vector<8x32xf32>,
    } else {
    }
    %c0 = arith.constant 0 : index
    %c0_1 = arith.constant 0 : index
    %3 = vector.load %arg21[%c0, %c0_1] : memref<8x32xf32, #tpu.memory_space<vmem>>, vector<8x32xf32>
    %c0_2 = arith.constant 0 : index
    %c0_3 = arith.constant 0 : index
    %c0_4 = arith.constant 0 : index
    %4 = vector.load %arg3[%c0_2, %c0_3, %c0_4] : memref<1x1x8xf32, #tpu.memory_space<vmem>>, vector<1x1x8xf32>
    %5 = vector.shape_cast %4 : vector<1x1x8xf32> to vector<1x8xf32>
    %6 = arith.truncf %3 : vector<8x32xf32> to vector<8x32xbf16>
    %c0_5 = arith.constant 0 : index
    %c0_6 = arith.constant 0 : index
    %c0_7 = arith.constant 0 : index
    %7 = vector.load %arg6[%c0_5, %c0_6, %c0_7] : memref<1x32x96xbf16, #tpu.memory_space<vmem>>, vector<1x32x96xbf16>
    %8 = vector.shape_cast %7 : vector<1x32x96xbf16> to vector<32x96xbf16>
    %cst = arith.constant dense<0.000000e+00> : vector<8x96xf32>
    %9 = tpu.matmul %6, %8, %cst {dimension_numbers = #tpu.dot_dimension_numbers<[1], [0], [0], [1], [0, 0, 1, 1], [], []>} : vector<8x32xbf16>, vector<32x96xbf16>, vector<8x96xf32> -> vector<8x96xf32>
    %c0_8 = arith.constant 0 : index
    %c0_9 = arith.constant 0 : index
    %c0_10 = arith.constant 0 : index
    %10 = vector.load %arg7[%c0_8, %c0_9, %c0_10] : memref<1x1x96xf32, #tpu.memory_space<vmem>>, vector<1x1x96xf32>
    %11 = vector.shape_cast %10 : vector<1x1x96xf32> to vector<1x96xf32>
    %12 = vector.broadcast %11 : vector<1x96xf32> to vector<8x96xf32>
    %13 = arith.addf %9, %12 : vector<8x96xf32>
    %14 = vector.extract_strided_slice %13 {offsets = [0, 0], sizes = [8, 16], strides = [1, 1]} : vector<8x96xf32> to vector<8x16xf32>
    %15 = vector.extract_strided_slice %13 {offsets = [0, 32], sizes = [8, 16], strides = [1, 1]} : vector<8x96xf32> to vector<8x16xf32>
    %16 = vector.extract_strided_slice %13 {offsets = [0, 64], sizes = [8, 16], strides = [1, 1]} : vector<8x96xf32> to vector<8x16xf32>
    %17 = arith.truncf %14 : vector<8x16xf32> to vector<8x16xbf16>
    %18 = arith.truncf %15 : vector<8x16xf32> to vector<8x16xbf16>
    %cst_11 = arith.constant dense<0.000000e+00> : vector<8x8xf32>
    %19 = tpu.matmul %17, %18, %cst_11 {dimension_numbers = #tpu.dot_dimension_numbers<[1], [1], [0], [0], [0, 0, 1, 0], [], []>} : vector<8x16xbf16>, vector<8x16xbf16>, vector<8x8xf32> -> vector<8x8xf32>
    %20 = vector.broadcast %5 : vector<1x8xf32> to vector<8x8xf32>
    %21 = arith.addf %19, %20 : vector<8x8xf32>
    %cst_12 = arith.constant dense<0xFF800000> : vector<8xf32>
    %22 = vector.multi_reduction <maximumf>, %21, %cst_12 [1] : vector<8x8xf32> to vector<8xf32>
    %23 = vector.shape_cast %22 : vector<8xf32> to vector<8x1xf32>
    %24 = vector.broadcast %23 : vector<8x1xf32> to vector<8x8xf32>
    %25 = arith.subf %21, %24 : vector<8x8xf32>
    %26 = math.exp %25 : vector<8x8xf32>
    %cst_13 = arith.constant dense<0.000000e+00> : vector<8xf32>
    %27 = vector.multi_reduction <add>, %26, %cst_13 [1] : vector<8x8xf32> to vector<8xf32>
    %28 = vector.shape_cast %27 : vector<8xf32> to vector<8x1xf32>
    %29 = tpu.reciprocal %28 {approx = true} : vector<8x1xf32> -> vector<8x1xf32>
    %30 = vector.broadcast %29 : vector<8x1xf32> to vector<8x8xf32>
    %31 = arith.mulf %26, %30 : vector<8x8xf32>
    %32 = arith.truncf %31 : vector<8x8xf32> to vector<8x8xbf16>
    %33 = arith.truncf %16 : vector<8x16xf32> to vector<8x16xbf16>
    %cst_14 = arith.constant dense<0.000000e+00> : vector<8x16xf32>
    %34 = tpu.matmul %32, %33, %cst_14 {dimension_numbers = #tpu.dot_dimension_numbers<[1], [0], [0], [1], [0, 0, 1, 1], [], []>} : vector<8x8xbf16>, vector<8x16xbf16>, vector<8x16xf32> -> vector<8x16xf32>
    %35 = vector.extract_strided_slice %13 {offsets = [0, 16], sizes = [8, 16], strides = [1, 1]} : vector<8x96xf32> to vector<8x16xf32>
    %36 = vector.extract_strided_slice %13 {offsets = [0, 48], sizes = [8, 16], strides = [1, 1]} : vector<8x96xf32> to vector<8x16xf32>
    %37 = vector.extract_strided_slice %13 {offsets = [0, 80], sizes = [8, 16], strides = [1, 1]} : vector<8x96xf32> to vector<8x16xf32>
    %38 = arith.truncf %35 : vector<8x16xf32> to vector<8x16xbf16>
    %39 = arith.truncf %36 : vector<8x16xf32> to vector<8x16xbf16>
    %cst_15 = arith.constant dense<0.000000e+00> : vector<8x8xf32>
    %40 = tpu.matmul %38, %39, %cst_15 {dimension_numbers = #tpu.dot_dimension_numbers<[1], [1], [0], [0], [0, 0, 1, 0], [], []>} : vector<8x16xbf16>, vector<8x16xbf16>, vector<8x8xf32> -> vector<8x8xf32>
    %41 = vector.broadcast %5 : vector<1x8xf32> to vector<8x8xf32>
    %42 = arith.addf %40, %41 : vector<8x8xf32>
    %cst_16 = arith.constant dense<0xFF800000> : vector<8xf32>
    %43 = vector.multi_reduction <maximumf>, %42, %cst_16 [1] : vector<8x8xf32> to vector<8xf32>
    %44 = vector.shape_cast %43 : vector<8xf32> to vector<8x1xf32>
    %45 = vector.broadcast %44 : vector<8x1xf32> to vector<8x8xf32>
    %46 = arith.subf %42, %45 : vector<8x8xf32>
    %47 = math.exp %46 : vector<8x8xf32>
    %cst_17 = arith.constant dense<0.000000e+00> : vector<8xf32>
    %48 = vector.multi_reduction <add>, %47, %cst_17 [1] : vector<8x8xf32> to vector<8xf32>
    %49 = vector.shape_cast %48 : vector<8xf32> to vector<8x1xf32>
    %50 = tpu.reciprocal %49 {approx = true} : vector<8x1xf32> -> vector<8x1xf32>
    %51 = vector.broadcast %50 : vector<8x1xf32> to vector<8x8xf32>
    %52 = arith.mulf %47, %51 : vector<8x8xf32>
    %53 = arith.truncf %52 : vector<8x8xf32> to vector<8x8xbf16>
    %54 = arith.truncf %37 : vector<8x16xf32> to vector<8x16xbf16>
    %cst_18 = arith.constant dense<0.000000e+00> : vector<8x16xf32>
    %55 = tpu.matmul %53, %54, %cst_18 {dimension_numbers = #tpu.dot_dimension_numbers<[1], [0], [0], [1], [0, 0, 1, 1], [], []>} : vector<8x8xbf16>, vector<8x16xbf16>, vector<8x16xf32> -> vector<8x16xf32>
    %56 = tpu.concatenate %34, %55 in 1 : vector<8x16xf32>, vector<8x16xf32> -> vector<8x32xf32>
    %57 = arith.truncf %56 : vector<8x32xf32> to vector<8x32xbf16>
    %c0_19 = arith.constant 0 : index
    %c0_20 = arith.constant 0 : index
    %c0_21 = arith.constant 0 : index
    %58 = vector.load %arg8[%c0_19, %c0_20, %c0_21] : memref<1x32x32xbf16, #tpu.memory_space<vmem>>, vector<1x32x32xbf16>
    %59 = vector.shape_cast %58 : vector<1x32x32xbf16> to vector<32x32xbf16>
    %cst_22 = arith.constant dense<0.000000e+00> : vector<8x32xf32>
    %60 = tpu.matmul %57, %59, %cst_22 {dimension_numbers = #tpu.dot_dimension_numbers<[1], [0], [0], [1], [0, 0, 1, 1], [], []>} : vector<8x32xbf16>, vector<32x32xbf16>, vector<8x32xf32> -> vector<8x32xf32>
    %c0_23 = arith.constant 0 : index
    %c0_24 = arith.constant 0 : index
    %c0_25 = arith.constant 0 : index
    %61 = vector.load %arg9[%c0_23, %c0_24, %c0_25] : memref<1x1x32xf32, #tpu.memory_space<vmem>>, vector<1x1x32xf32>
    %62 = vector.shape_cast %61 : vector<1x1x32xf32> to vector<1x32xf32>
    %63 = vector.broadcast %62 : vector<1x32xf32> to vector<8x32xf32>
    %64 = arith.addf %60, %63 : vector<8x32xf32>
    %65 = arith.addf %3, %64 : vector<8x32xf32>
    %c0_26 = arith.constant 0 : index
    %c0_27 = arith.constant 0 : index
    %c0_28 = arith.constant 0 : index
    %66 = vector.load %arg10[%c0_26, %c0_27, %c0_28] : memref<1x1x32xf32, #tpu.memory_space<vmem>>, vector<1x1x32xf32>
    %67 = vector.shape_cast %66 : vector<1x1x32xf32> to vector<1x32xf32>
    %c0_29 = arith.constant 0 : index
    %c0_30 = arith.constant 0 : index
    %c0_31 = arith.constant 0 : index
    %68 = vector.load %arg11[%c0_29, %c0_30, %c0_31] : memref<1x1x32xf32, #tpu.memory_space<vmem>>, vector<1x1x32xf32>
    %69 = vector.shape_cast %68 : vector<1x1x32xf32> to vector<1x32xf32>
    %cst_32 = arith.constant dense<0.000000e+00> : vector<8xf32>
    %70 = vector.multi_reduction <add>, %65, %cst_32 [1] : vector<8x32xf32> to vector<8xf32>
    %71 = vector.shape_cast %70 : vector<8xf32> to vector<8x1xf32>
    %cst_33 = arith.constant 3.200000e+01 : f32
    %72 = vector.broadcast %cst_33 : f32 to vector<8x1xf32>
    %73 = arith.divf %71, %72 : vector<8x1xf32>
    %74 = vector.broadcast %73 : vector<8x1xf32> to vector<8x32xf32>
    %75 = arith.subf %65, %74 : vector<8x32xf32>
    %76 = arith.mulf %75, %75 : vector<8x32xf32>
    %cst_34 = arith.constant dense<0.000000e+00> : vector<8xf32>
    %77 = vector.multi_reduction <add>, %76, %cst_34 [1] : vector<8x32xf32> to vector<8xf32>
    %78 = vector.shape_cast %77 : vector<8xf32> to vector<8x1xf32>
    %cst_35 = arith.constant 3.200000e+01 : f32
    %79 = vector.broadcast %cst_35 : f32 to vector<8x1xf32>
    %80 = arith.divf %78, %79 : vector<8x1xf32>
    %81 = vector.broadcast %73 : vector<8x1xf32> to vector<8x32xf32>
    %82 = arith.subf %65, %81 : vector<8x32xf32>
    %cst_36 = arith.constant 9.99999996E-13 : f32
    %83 = vector.broadcast %cst_36 : f32 to vector<8x1xf32>
    %84 = arith.addf %80, %83 : vector<8x1xf32>
    %85 = math.rsqrt %84 : vector<8x1xf32>
    %86 = vector.broadcast %85 : vector<8x1xf32> to vector<8x32xf32>
    %87 = arith.mulf %82, %86 : vector<8x32xf32>
    %88 = vector.broadcast %67 : vector<1x32xf32> to vector<8x32xf32>
    %89 = arith.mulf %87, %88 : vector<8x32xf32>
    %90 = vector.broadcast %69 : vector<1x32xf32> to vector<8x32xf32>
    %91 = arith.addf %89, %90 : vector<8x32xf32>
    %92 = arith.truncf %91 : vector<8x32xf32> to vector<8x32xbf16>
    %c0_37 = arith.constant 0 : index
    %c0_38 = arith.constant 0 : index
    %c0_39 = arith.constant 0 : index
    %93 = vector.load %arg12[%c0_37, %c0_38, %c0_39] : memref<1x32x64xbf16, #tpu.memory_space<vmem>>, vector<1x32x64xbf16>
    %94 = vector.shape_cast %93 : vector<1x32x64xbf16> to vector<32x64xbf16>
    %cst_40 = arith.constant dense<0.000000e+00> : vector<8x64xf32>
    %95 = tpu.matmul %92, %94, %cst_40 {dimension_numbers = #tpu.dot_dimension_numbers<[1], [0], [0], [1], [0, 0, 1, 1], [], []>} : vector<8x32xbf16>, vector<32x64xbf16>, vector<8x64xf32> -> vector<8x64xf32>
    %c0_41 = arith.constant 0 : index
    %c0_42 = arith.constant 0 : index
    %c0_43 = arith.constant 0 : index
    %96 = vector.load %arg13[%c0_41, %c0_42, %c0_43] : memref<1x1x64xf32, #tpu.memory_space<vmem>>, vector<1x1x64xf32>
    %97 = vector.shape_cast %96 : vector<1x1x64xf32> to vector<1x64xf32>
    %98 = vector.broadcast %97 : vector<1x64xf32> to vector<8x64xf32>
    %99 = arith.addf %95, %98 : vector<8x64xf32>
    %cst_44 = arith.constant 5.000000e-01 : f32
    %100 = vector.broadcast %cst_44 : f32 to vector<8x64xf32>
    %101 = arith.mulf %100, %99 : vector<8x64xf32>
    %cst_45 = arith.constant 4.471500e-02 : f32
    %102 = vector.broadcast %cst_45 : f32 to vector<8x64xf32>
    %103 = arith.mulf %102, %99 : vector<8x64xf32>
    %104 = arith.mulf %103, %99 : vector<8x64xf32>
    %105 = arith.mulf %104, %99 : vector<8x64xf32>
    %106 = arith.addf %99, %105 : vector<8x64xf32>
    %cst_46 = arith.constant 0.797884583 : f32
    %107 = vector.broadcast %cst_46 : f32 to vector<8x64xf32>
    %108 = arith.mulf %107, %106 : vector<8x64xf32>
    %109 = math.tanh %108 : vector<8x64xf32>
    %cst_47 = arith.constant 1.000000e+00 : f32
    %110 = vector.broadcast %cst_47 : f32 to vector<8x64xf32>
    %111 = arith.addf %110, %109 : vector<8x64xf32>
    %112 = arith.mulf %101, %111 : vector<8x64xf32>
    %113 = arith.truncf %112 : vector<8x64xf32> to vector<8x64xbf16>
    %c0_48 = arith.constant 0 : index
    %c0_49 = arith.constant 0 : index
    %c0_50 = arith.constant 0 : index
    %114 = vector.load %arg14[%c0_48, %c0_49, %c0_50] : memref<1x64x32xbf16, #tpu.memory_space<vmem>>, vector<1x64x32xbf16>
    %115 = vector.shape_cast %114 : vector<1x64x32xbf16> to vector<64x32xbf16>
    %cst_51 = arith.constant dense<0.000000e+00> : vector<8x32xf32>
    %116 = tpu.matmul %113, %115, %cst_51 {dimension_numbers = #tpu.dot_dimension_numbers<[1], [0], [0], [1], [0, 0, 1, 1], [], []>} : vector<8x64xbf16>, vector<64x32xbf16>, vector<8x32xf32> -> vector<8x32xf32>
    %c0_52 = arith.constant 0 : index
    %c0_53 = arith.constant 0 : index
    %c0_54 = arith.constant 0 : index
    %117 = vector.load %arg15[%c0_52, %c0_53, %c0_54] : memref<1x1x32xf32, #tpu.memory_space<vmem>>, vector<1x1x32xf32>
    %118 = vector.shape_cast %117 : vector<1x1x32xf32> to vector<1x32xf32>
    %119 = vector.broadcast %118 : vector<1x32xf32> to vector<8x32xf32>
    %120 = arith.addf %116, %119 : vector<8x32xf32>
    %121 = arith.addf %91, %120 : vector<8x32xf32>
    %c0_55 = arith.constant 0 : index
    %c0_56 = arith.constant 0 : index
    %c0_57 = arith.constant 0 : index
    %122 = vector.load %arg16[%c0_55, %c0_56, %c0_57] : memref<1x1x32xf32, #tpu.memory_space<vmem>>, vector<1x1x32xf32>
    %123 = vector.shape_cast %122 : vector<1x1x32xf32> to vector<1x32xf32>
    %c0_58 = arith.constant 0 : index
    %c0_59 = arith.constant 0 : index
    %c0_60 = arith.constant 0 : index
    %124 = vector.load %arg17[%c0_58, %c0_59, %c0_60] : memref<1x1x32xf32, #tpu.memory_space<vmem>>, vector<1x1x32xf32>
    %125 = vector.shape_cast %124 : vector<1x1x32xf32> to vector<1x32xf32>
    %cst_61 = arith.constant dense<0.000000e+00> : vector<8xf32>
    %126 = vector.multi_reduction <add>, %121, %cst_61 [1] : vector<8x32xf32> to vector<8xf32>
    %127 = vector.shape_cast %126 : vector<8xf32> to vector<8x1xf32>
    %cst_62 = arith.constant 3.200000e+01 : f32
    %128 = vector.broadcast %cst_62 : f32 to vector<8x1xf32>
    %129 = arith.divf %127, %128 : vector<8x1xf32>
    %130 = vector.broadcast %129 : vector<8x1xf32> to vector<8x32xf32>
    %131 = arith.subf %121, %130 : vector<8x32xf32>
    %132 = arith.mulf %131, %131 : vector<8x32xf32>
    %cst_63 = arith.constant dense<0.000000e+00> : vector<8xf32>
    %133 = vector.multi_reduction <add>, %132, %cst_63 [1] : vector<8x32xf32> to vector<8xf32>
    %134 = vector.shape_cast %133 : vector<8xf32> to vector<8x1xf32>
    %cst_64 = arith.constant 3.200000e+01 : f32
    %135 = vector.broadcast %cst_64 : f32 to vector<8x1xf32>
    %136 = arith.divf %134, %135 : vector<8x1xf32>
    %137 = vector.broadcast %129 : vector<8x1xf32> to vector<8x32xf32>
    %138 = arith.subf %121, %137 : vector<8x32xf32>
    %cst_65 = arith.constant 9.99999996E-13 : f32
    %139 = vector.broadcast %cst_65 : f32 to vector<8x1xf32>
    %140 = arith.addf %136, %139 : vector<8x1xf32>
    %141 = math.rsqrt %140 : vector<8x1xf32>
    %142 = vector.broadcast %141 : vector<8x1xf32> to vector<8x32xf32>
    %143 = arith.mulf %138, %142 : vector<8x32xf32>
    %144 = vector.broadcast %123 : vector<1x32xf32> to vector<8x32xf32>
    %145 = arith.mulf %143, %144 : vector<8x32xf32>
    %146 = vector.broadcast %125 : vector<1x32xf32> to vector<8x32xf32>
    %147 = arith.addf %145, %146 : vector<8x32xf32>
    %c0_66 = arith.constant 0 : index
    %c0_67 = arith.constant 0 : index
    %148 = vector.load %arg21[%c0_66, %c0_67] : memref<8x32xf32, #tpu.memory_space<vmem>>, vector<8x32xf32>
    tpu.vector_store %arg21[%c0_66, %c0_67], %147 {strides = array<i32>} : memref<8x32xf32, #tpu.memory_space<vmem>>, vector<8x32xf32>,
    %c1_i32 = arith.constant 1 : i32
    %149 = arith.cmpi eq, %arg1, %c1_i32 : i32
    %150 = arith.extui %149 : i1 to i32
    %c0_i32_68 = arith.constant 0 : i32
    %151 = arith.cmpi ne, %150, %c0_i32_68 : i32
    scf.if %151 {
      %152 = arith.truncf %147 : vector<8x32xf32> to vector<8x32xbf16>
      %c0_69 = arith.constant 0 : index
      %c0_70 = arith.constant 0 : index
      %153 = vector.load %arg18[%c0_69, %c0_70] : memref<32x128xbf16, #tpu.memory_space<vmem>>, vector<32x128xbf16>
      %cst_71 = arith.constant dense<0.000000e+00> : vector<8x128xf32>
      %154 = tpu.matmul %152, %153, %cst_71 {dimension_numbers = #tpu.dot_dimension_numbers<[1], [0], [0], [1], [0, 0, 1, 1], [], []>} : vector<8x32xbf16>, vector<32x128xbf16>, vector<8x128xf32> -> vector<8x128xf32>
      %c0_72 = arith.constant 0 : index
      %c0_73 = arith.constant 0 : index
      %155 = vector.load %arg19[%c0_72, %c0_73] : memref<1x128xf32, #tpu.memory_space<vmem>>, vector<1x128xf32>
      %156 = vector.broadcast %155 : vector<1x128xf32> to vector<8x128xf32>
      %157 = arith.addf %154, %156 : vector<8x128xf32>
      %c0_74 = arith.constant 0 : index
      %c0_75 = arith.constant 0 : index
      %158 = vector.load %arg20[%c0_74, %c0_75] : memref<8x128xf32, #tpu.memory_space<vmem>>, vector<8x128xf32>
      tpu.vector_store %arg20[%c0_74, %c0_75], %157 {strides = array<i32>} : memref<8x128xf32, #tpu.memory_space<vmem>>, vector<8x128xf32>,
    } else {
    }
    return
  }
  func.func @transform_0(%arg0: i32, %arg1: i32) -> (i32, i32) {
    %c0_i32 = arith.constant 0 : i32
    %c0_i32_0 = arith.constant 0 : i32
    return %arg0, %c0_i32 : i32, i32
  }
  func.func @transform_1(%arg0: i32, %arg1: i32) -> (i32, i32, i32) {
    %c0_i32 = arith.constant 0 : i32
    %c0_i32_0 = arith.constant 0 : i32
    %c0_i32_1 = arith.constant 0 : i32
    return %arg0, %c0_i32, %c0_i32_0 : i32, i32, i32
  }
  func.func @transform_2(%arg0: i32, %arg1: i32) -> (i32, i32) {
    %c0_i32 = arith.constant 0 : i32
    %c0_i32_0 = arith.constant 0 : i32
    %c0_i32_1 = arith.constant 0 : i32
    return %c0_i32, %c0_i32_0 : i32, i32
  }
  func.func @transform_3(%arg0: i32, %arg1: i32) -> (i32, i32) {
    %c0_i32 = arith.constant 0 : i32
    %c0_i32_0 = arith.constant 0 : i32
    %c0_i32_1 = arith.constant 0 : i32
    return %c0_i32, %c0_i32_0 : i32, i32
  }
  func.func @transform_4(%arg0: i32, %arg1: i32) -> (i32, i32, i32) {
    %c0_i32 = arith.constant 0 : i32
    %c0_i32_0 = arith.constant 0 : i32
    %c0_i32_1 = arith.constant 0 : i32
    return %arg1, %c0_i32, %c0_i32_0 : i32, i32, i32
  }
  func.func @transform_5(%arg0: i32, %arg1: i32) -> (i32, i32, i32) {
    %c0_i32 = arith.constant 0 : i32
    %c0_i32_0 = arith.constant 0 : i32
    %c0_i32_1 = arith.constant 0 : i32
    return %arg1, %c0_i32, %c0_i32_0 : i32, i32, i32
  }
  func.func @transform_6(%arg0: i32, %arg1: i32) -> (i32, i32, i32) {
    %c0_i32 = arith.constant 0 : i32
    %c0_i32_0 = arith.constant 0 : i32
    %c0_i32_1 = arith.constant 0 : i32
    return %arg1, %c0_i32, %c0_i32_0 : i32, i32, i32
  }
  func.func @transform_7(%arg0: i32, %arg1: i32) -> (i32, i32, i32) {
    %c0_i32 = arith.constant 0 : i32
    %c0_i32_0 = arith.constant 0 : i32
    %c0_i32_1 = arith.constant 0 : i32
    return %arg1, %c0_i32, %c0_i32_0 : i32, i32, i32
  }
  func.func @transform_8(%arg0: i32, %arg1: i32) -> (i32, i32, i32) {
    %c0_i32 = arith.constant 0 : i32
    %c0_i32_0 = arith.constant 0 : i32
    %c0_i32_1 = arith.constant 0 : i32
    return %arg1, %c0_i32, %c0_i32_0 : i32, i32, i32
  }
  func.func @transform_9(%arg0: i32, %arg1: i32) -> (i32, i32, i32) {
    %c0_i32 = arith.constant 0 : i32
    %c0_i32_0 = arith.constant 0 : i32
    %c0_i32_1 = arith.constant 0 : i32
    return %arg1, %c0_i32, %c0_i32_0 : i32, i32, i32
  }
  func.func @transform_10(%arg0: i32, %arg1: i32) -> (i32, i32, i32) {
    %c0_i32 = arith.constant 0 : i32
    %c0_i32_0 = arith.constant 0 : i32
    %c0_i32_1 = arith.constant 0 : i32
    return %arg1, %c0_i32, %c0_i32_0 : i32, i32, i32
  }
  func.func @transform_11(%arg0: i32, %arg1: i32) -> (i32, i32, i32) {
    %c0_i32 = arith.constant 0 : i32
    %c0_i32_0 = arith.constant 0 : i32
    %c0_i32_1 = arith.constant 0 : i32
    return %arg1, %c0_i32, %c0_i32_0 : i32, i32, i32
  }
  func.func @transform_12(%arg0: i32, %arg1: i32) -> (i32, i32, i32) {
    %c0_i32 = arith.constant 0 : i32
    %c0_i32_0 = arith.constant 0 : i32
    %c0_i32_1 = arith.constant 0 : i32
    return %arg1, %c0_i32, %c0_i32_0 : i32, i32, i32
  }
  func.func @transform_13(%arg0: i32, %arg1: i32) -> (i32, i32, i32) {
    %c0_i32 = arith.constant 0 : i32
    %c0_i32_0 = arith.constant 0 : i32
    %c0_i32_1 = arith.constant 0 : i32
    return %arg1, %c0_i32, %c0_i32_0 : i32, i32, i32
  }
  func.func @transform_14(%arg0: i32, %arg1: i32) -> (i32, i32, i32) {
    %c0_i32 = arith.constant 0 : i32
    %c0_i32_0 = arith.constant 0 : i32
    %c0_i32_1 = arith.constant 0 : i32
    return %arg1, %c0_i32, %c0_i32_0 : i32, i32, i32
  }
  func.func @transform_15(%arg0: i32, %arg1: i32) -> (i32, i32, i32) {
    %c0_i32 = arith.constant 0 : i32
    %c0_i32_0 = arith.constant 0 : i32
    %c0_i32_1 = arith.constant 0 : i32
    return %arg1, %c0_i32, %c0_i32_0 : i32, i32, i32
  }
  func.func @transform_16(%arg0: i32, %arg1: i32) -> (i32, i32) {
    %c0_i32 = arith.constant 0 : i32
    %c0_i32_0 = arith.constant 0 : i32
    %c0_i32_1 = arith.constant 0 : i32
    return %c0_i32, %c0_i32_0 : i32, i32
  }
  func.func @transform_17(%arg0: i32, %arg1: i32) -> (i32, i32) {
    %c0_i32 = arith.constant 0 : i32
    %c0_i32_0 = arith.constant 0 : i32
    %c0_i32_1 = arith.constant 0 : i32
    return %c0_i32, %c0_i32_0 : i32, i32
  }
  func.func @transform_18(%arg0: i32, %arg1: i32) -> (i32, i32) {
    %c0_i32 = arith.constant 0 : i32
    %c0_i32_0 = arith.constant 0 : i32
    return %arg0, %c0_i32 : i32, i32
  }
}

</mosaic_0001>

<bundles_post_ra>
// kernel: tpu_custom_call.1
= control target key start
LH: loop header
LB: loop body
LE: loop exit
PB: predicated region body
PF: predicated region fallthrough
CT: control target
= control target key end

     0   :  { %s3507_s0 = inlined_call_operand.hbm [shape: f32[16,32], index: 0, kind: input, shape index: {}]   ;;  %s3508_s1 = inlined_call_operand.hbm [shape: f32[2,1,8], index: 1, kind: input, shape index: {}]   ;;  %s3509_s2 = inlined_call_operand.vmem [shape: f32[1,32], index: 2, kind: input, shape index: {}]   ;;  %s3510_s3 = inlined_call_operand.hbm [shape: f32[1,32], index: 3, kind: input, shape index: {}]   ;;  %s3511_s4 = inlined_call_operand.vmem [shape: bf16[2,32,96], index: 4, kind: input, shape index: {}]   ;;  %s3512_s5 = inlined_call_operand.hbm [shape: f32[2,1,96], index: 5, kind: input, shape index: {}]   ;;  %s3513_s6 = inlined_call_operand.vmem [shape: bf16[2,32,32], index: 6, kind: input, shape index: {}]   ;;  %s3514_s7 = inlined_call_operand.hbm [shape: f32[2,1,32], index: 7, kind: input, shape index: {}]   ;;  %s3515_s8 = inlined_call_operand.hbm [shape: f32[2,1,32], index: 8, kind: input, shape index: {}]   ;;  %s3516_s9 = inlined_call_operand.hbm [shape: f32[2,1,32], index: 9, kind: input, shape index: {}]   ;;  %s3517_s10 = inlined_call_operand.vmem [shape: bf16[2,32,64], index: 10, kind: input, shape index: {}]   ;;  %s3518_s11 = inlined_call_operand.hbm [shape: f32[2,1,64], index: 11, kind: input, shape index: {}]   ;;  %s3519_s12 = inlined_call_operand.vmem [shape: bf16[2,64,32], index: 12, kind: input, shape index: {}]   ;;  %s3520_s13 = inlined_call_operand.hbm [shape: f32[2,1,32], index: 13, kind: input, shape index: {}]   ;;  %s3521_s14 = inlined_call_operand.vmem [shape: f32[2,1,32], index: 14, kind: input, shape index: {}]   ;;  %s3522_s15 = inlined_call_operand.vmem [shape: f32[2,1,32], index: 15, kind: input, shape index: {}]   ;;  %s3523_s16 = inlined_call_operand.vmem [shape: bf16[32,128], index: 16, kind: input, shape index: {}]   ;;  %s3524_s17 = inlined_call_operand.vmem [shape: f32[1,128], index: 17, kind: input, shape index: {}]   ;;  %s3525_s18 = inlined_call_operand.hbm [shape: f32[16,128], index: 18, kind: output, shape index: {}]  }
   0x1   :  { %3561 = sst [smem:[#allocation41_spill]] %s3507_s0 }
   0x2   :  { %3562 = sst [smem:[#allocation42_spill]] %s3508_s1 }
   0x3   :  { %3563 = sst [smem:[#allocation43_spill]] %s3509_s2 }
   0x4   :  { %3564 = sst [smem:[#allocation44_spill]] %s3510_s3 }
   0x5   :  { %3565 = sst [smem:[#allocation45_spill]] %s3511_s4 }
   0x6   :  { %3566 = sst [smem:[#allocation46_spill]] %s3512_s5 }
   0x7   :  { %3567 = sst [smem:[#allocation47_spill]] %s3513_s6 }
   0x8   :  { %3568 = sst [smem:[#allocation48_spill]] %s3514_s7 }
   0x9   :  { %3569 = sst [smem:[#allocation49_spill]] %s3515_s8 }
   0xa   :  { %3570 = sst [smem:[#allocation50_spill]] %s3516_s9 }
   0xb   :  { %3571 = sst [smem:[#allocation51_spill]] %s3517_s10 }
   0xc   :  { %3572 = sst [smem:[#allocation52_spill]] %s3518_s11 }
   0xd   :  { %3573 = sst [smem:[#allocation53_spill]] %s3519_s12 }
   0xe   :  { %3574 = sst [smem:[#allocation54_spill]] %s3520_s13 }
   0xf   :  { %3575 = sst [smem:[#allocation55_spill]] %s3521_s14 }
  0x10   :  { %3576 = sst [smem:[#allocation56_spill]] %s3522_s15 }
  0x11   :  { %3577 = sst [smem:[#allocation57_spill]] %s3523_s16 }
  0x12   :  { %3578 = sst [smem:[#allocation58_spill]] %s3524_s17 }
  0x13   :  { %3579 = sst [smem:[#allocation59_spill]] %s3525_s18 }
  0x14   :  { %23 = vsyncpa [#allocation4], 0 }
  0x15   :  { %25 = vsyncpa [#allocation4 + $0x1], 0 }
  0x16   :  { %26 = vsyncpa [#allocation7], 0 }
  0x17   :  { %28 = vsyncpa [#allocation7 + $0x1], 0 }
  0x18   :  { %29 = vsyncpa [#allocation10], 0 }
  0x19   :  { %31 = vsyncpa [#allocation10 + $0x1], 0 }
  0x1a   :  { %32 = vsyncpa [#allocation13], 0 }
  0x1b   :  { %34 = vsyncpa [#allocation13 + $0x1], 0 }
  0x1c   :  { %35 = vsyncpa [#allocation16], 0 }
  0x1d   :  { %37 = vsyncpa [#allocation16 + $0x1], 0 }
  0x1e   :  { %38 = vsyncpa [#allocation5], 0 }
  0x1f   :  { %40 = vsyncpa [#allocation5 + $0x1], 0  ;;  %s2831_s27 = smov 0   ;;  %s2833_s28 = smov 0  }
  0x20   :  { %s2835_s29 = smov 0   ;;  %s2837_s30 = smov 0  }
  0x21   :  { %s2839_s0 = smov 0   ;;  %s2841_s19 = smov 0  }
  0x22   :  { %s2843_s1 = smov 0   ;;  %s2845_s20 = smov 0  }
  0x23   :  { %s2847_s21 = smov 0   ;;  %s2849_s22 = smov 0  }
  0x24   :  { %s2851_s2 = smov 0  }
  0x25 LB: > { %3580 = sst [smem:[#allocation26_spill]] %s2678_s28  ;;  %s2885_s23 = sadd.s32 4294967295, %s2714_s2   ;;  %s2714_s2 = sphi %s2851_s2, %s46_s2   ;;  %s2710_s22 = sphi %s2849_s22, %s3676_s22   ;;  %s2706_s21 = sphi %s2847_s21, %s3675_s21   ;;  %s2702_s20 = sphi %s2845_s20, %s3674_s20   ;;  %s2698_s1 = sphi %s2843_s1, %s3673_s1   ;;  %s2694_s19 = sphi %s2841_s19, %s3672_s19   ;;  %s2690_s0 = sphi %s2839_s0, %s3671_s0   ;;  %s2686_s30 = sphi %s2837_s30, %s3670_s30   ;;  %s2682_s29 = sphi %s2835_s29, %s3678_s29   ;;  %s2678_s28 = sphi %s2833_s28, %s3677_s28   ;;  %s2674_s27 = sphi %s2831_s27, %s3668_s27  }
  0x26   : > { %3581 = sst [smem:[#allocation27_spill]] %s2686_s30  ;;  %s1957_s24 = sadd.s32 4294967294, %s2714_s2  }
  0x27   : > { %3582 = sst [smem:[#allocation28_spill]] %s2690_s0  ;;  %p3534_p0 = scmp.eq.s32.totalorder %s2714_s2, 0 }
  0x28   : > { %3583 = sst [smem:[#allocation29_spill]] %s2694_s19  ;;  %p78_p1 = scmp.ne.s32.totalorder %s2690_s0, %s2686_s30 }
  0x29   : > { %3584 = sst [smem:[#allocation30_spill]] %s2698_s1  ;;  %p3532_p2 = scmp.eq.s32.totalorder %s2885_s23, 0 }
  0x2a   : > { %3585 = sst [smem:[#allocation31_spill]] %s2702_s20  ;;  %p192_p3 = scmp.ne.s32.totalorder %s2682_s29, %s2678_s28 }
  0x2b   : > { %3586 = sst [smem:[#allocation32_spill]] %s2706_s21  ;;  %p198_p4 = scmp.ne.s32.totalorder %s2678_s28, %s2674_s27 }
  0x2c   : > { %3587 = sst [smem:[#allocation33_spill]] %s2710_s22  ;;  %p2898_p5 = por %p3532_p2, %p78_p1 }
  0x2d   : > { %p2905_p7 = por %p192_p3, %p3534_p0  ;;  %p2911_p8 = por %p198_p4, %p3532_p2 }
  0x2e   : > { %s3588_s26 = scalar_select %p2898_p5, 1, 0 }
  0x2f   : > { %s3591_s25 = scalar_select %p2911_p8, 1, 0 }
  0x30   : > { %3589 = sst [smem:[#allocation34_spill]] %s3588_s26  ;;  %p530_p9 = scmp.eq.s32.totalorder %s1957_s24, 3 }
  0x31   : > { %3592 = sst [smem:[#allocation35_spill]] %s3591_s25  ;;  %p1958_p10 = scmp.ge.s32.totalorder %s2714_s2, 1 }
  0x32   : > { %p537_p11 = scmp.lt.s32.totalorder %s2714_s2, 5  ;;  %p2917_p12 = por %p530_p9, %p78_p1 }
  0x33   : > { %s2716_s20 = smov [#allocation8]   ;;  %p3533_p4 = scmp.lt.s32.totalorder %s2714_s2, 4 }
  0x34   : > { %s3593_s27 = scalar_select %p2917_p12, 1, 0 }
  0x35   : > { %p2921_p13 = pnand %p1958_p10, %p537_p11  ;;  %s553_s17 = sshll.u32 %s2716_s20, 4  ;;  %s554_s17 = int_to_ptr.vmem [resolvable:$true] %s553_s17 }
  0x36   : > { %3594 = sst [smem:[#allocation36_spill]] %s3593_s27  ;;  %s2929_s16 = sand.u32 1, %s2714_s2  }
  0x37   : > { %s3595_s30 = scalar_select %p2921_p13, 1, 0 }
  0x38   : > { %p2140_p3 = pneg %p2921_p13  ;;  %p2941_p1 = pnand %p3533_p4, %p2905_p7 }
  0x39   : > { %s3598_s3 = sld [smem:[#allocation44_spill]] }
  0x3a   : > { %p2933_p6 = pnand %p2140_p3, %p3532_p2 }
  0x3b   : > { %s3597_s27 = scalar_select %p2941_p1, 1, 0 }
  0x3c   : > { %p2306_p10 = pneg %p2933_p6 }
  0x3f   : > { %s2304_s14 = scalar_lea.hbm %s3598_s3, 16 }
  0x40   : > { %p2305_p9 = scmp.ne.s32.totalorder %s3598_s3, %s2304_s14  ;;  %p2311_p2 = scmp.lt.u32.totalorder %s2304_s14, %s3598_s3 }
  0x42   : > { %p2307_p11 = pnand %p2306_p10, %p2305_p9 }
  0x44   : > { %p2308_p3 = pneg %p2307_p11 }
  0x46   : > { %p2313_p7 = pnand %p2311_p2, %p2308_p3 }
  0x48   : > { %2316 = shalt.err (!%p2313_p7)
}
  0x49   : > { %s2317_s4 = scalar_lea.vmem %s554_s17, 16  ;;  %s2324_s15 = scalar_lea.vmem %s554_s17, 32 }
  0x4a   : > { %p2318_p4 = scmp.ne.s32.totalorder %s554_s17, %s2317_s4  ;;  %p2325_p8 = scmp.lt.s32.totalorder %s554_s17, %s554_s17 }
  0x4b   : > { %p2326_p5 = scmp.lt.s32.totalorder %s2324_s15, %s2317_s4 }
  0x4c   : > { %p2320_p0 = pnand %p2318_p4, %p2306_p10 }
  0x4d   : > { %p2327_p13 = por %p2326_p5, %p2325_p8 }
  0x4e   : > { %p2321_p12 = pneg %p2320_p0 }
  0x50   : > { %p2328_p1 = pnand %p2327_p13, %p2321_p12 }
  0x52   : > { %2331 = shalt.err (!%p2328_p1)
}
  0x53   : > { %2143 = dma.hbm_to_vmem [thread:$0]  (!%p2933_p6), %s3598_s3, 16, %s554_s17, [#allocation7]  }
  0x54   : > { %s55_s6 = sadd.s32 1, %s2706_s21  ;;  %s2963_s14 = sand.u32 1, %s2682_s29  }
  0x55   : > { %p2965_p0 = scmp.ge.s32.totalorder %s55_s6, 2  ;;  %s2970_s24 = sshll.u32 %s2706_s21, 4 }
  0x56   : > { %s616_s20 = scalar_lea.vmem [#allocation9], %s2963_s14  ;;  %s3601_s5 = sld [smem:[#allocation46_spill]] }
  0x57   : > { %s3599_s4 = scalar_select %p2965_p0, 1, 0 }
  0x58   : > { %s623_s18 = sshll.u32 %s616_s20, 4  ;;  %s3680_s6 = smov (%p2965_p0, %s55_s6), 0  ;;  %s2983_s18 = int_to_ptr.vmem [resolvable:$true] %s623_s18 }
  0x59   : > { %3600 = sst [smem:[#allocation37_spill]] %s3680_s6  ;;  %s182_s12 = ssub.s32 %s2706_s21, %s3680_s6 }
  0x5a   : > { %p2987_p2 = scmp.eq.s32.totalorder %s182_s12, 0  ;;  %p3603_p6 = scmp.ne.s32.totalorder %s3597_s27, 0 }
  0x5c   : > { %s2981_s17 = scalar_lea.hbm %s3601_s5, %s2970_s24  ;;  %p2996_p8 = pneg %p3603_p6 }
  0x5d   : > { %s3602_s3 = scalar_select %p2987_p2, 1, 0 }
  0x5e   : > { %s2332_s1 = scalar_lea.hbm %s2981_s17, 16  ;;  %s2337_s6 = scalar_lea.hbm %s3601_s5, 32 }
  0x5f   : > { %p2333_p5 = scmp.ne.s32.totalorder %s2981_s17, %s2332_s1  ;;  %p2338_p4 = scmp.lt.u32.totalorder %s2981_s17, %s3601_s5 }
  0x60   : > { %s3604_s15 = scalar_select %p2996_p8, 1, 0 }
  0x61   : > { %p2335_p12 = pnand %p2996_p8, %p2333_p5  ;;  %p2339_p1 = scmp.lt.u32.totalorder %s2337_s6, %s2332_s1 }
  0x62   : > { %p2341_p10 = scmp.lt.u32.totalorder %s2332_s1, %s2981_s17 }
  0x63   : > { %p2336_p13 = pneg %p2335_p12  ;;  %p2340_p9 = por %p2339_p1, %p2338_p4 }
  0x65   : > { %p2342_p11 = por %p2341_p10, %p2340_p9 }
  0x67   : > { %p2343_p3 = pnand %p2342_p11, %p2336_p13 }
  0x69   : > { %2346 = shalt.err (!%p2343_p3)
}
  0x6a   : > { %s2347_s20 = scalar_lea.vmem %s2983_s18, 16  ;;  %s2717_s25 = smov [#allocation9]  }
  0x6b   : > { %p2348_p7 = scmp.ne.s32.totalorder %s2983_s18, %s2347_s20  ;;  %s2352_s10 = sshll.u32 %s2717_s25, 4  ;;  %s2353_s10 = int_to_ptr.vmem [resolvable:$false] %s2352_s10 }
  0x6c   : > { %s2354_s21 = scalar_lea.vmem %s2353_s10, 32  ;;  %p2355_p0 = scmp.lt.s32.totalorder %s2983_s18, %s2353_s10 }
  0x6d   : > { %p2350_p5 = pnand %p2348_p7, %p2996_p8  ;;  %p2356_p2 = scmp.lt.s32.totalorder %s2354_s21, %s2347_s20 }
  0x6f   : > { %p2351_p12 = pneg %p2350_p5  ;;  %p2357_p4 = por %p2356_p2, %p2355_p0 }
  0x71   : > { %p2358_p1 = pnand %p2357_p4, %p2351_p12 }
  0x73   : > { %2361 = shalt.err (!%p2358_p1)
}
  0x74   : > { %s3605_s1 = scalar_lea.sflag [#allocation10], %s2929_s16  ;;  %s3606_s6 = sadd.s32 1, %s2682_s29 }
  0x75   : > { %2153 = dma.hbm_to_vmem [thread:$0]  (!%p3603_p6), %s2981_s17, 16, %s2983_s18, %s3605_s1  }
  0x76   : > { %p3607_p13 = scmp.ne.s32.totalorder %s3602_s3, 0  ;;  %s3609_s8 = sld [smem:[#allocation49_spill]] }
  0x77   : > { %s658_s21 = scalar_lea.vmem [#allocation12], %s2963_s14  ;;  %s3549_s28 = scalar_lea.sflag [#allocation13], %s2929_s16 }
  0x78   : > { %s3026_s20 = scalar_select %p3607_p13, %s2682_s29, %s3606_s6  }
  0x79   : > { %s665_s5 = sshll.u32 %s658_s21, 4  ;;  %s666_s5 = int_to_ptr.vmem [resolvable:$true] %s665_s5 }
  0x7a   : > { %3608 = sst [smem:[#allocation38_spill]] %s3026_s20 }
  0x7c   : > { %s3032_s10 = scalar_lea.hbm %s3609_s8, %s2970_s24  ;;  %s2367_s17 = scalar_lea.hbm %s3609_s8, 32 }
  0x7d   : > { %s2362_s26 = scalar_lea.hbm %s3032_s10, 16  ;;  %p2368_p10 = scmp.lt.u32.totalorder %s3032_s10, %s3609_s8 }
  0x7e   : > { %p2363_p0 = scmp.ne.s32.totalorder %s3032_s10, %s2362_s26  ;;  %p2369_p11 = scmp.lt.u32.totalorder %s2367_s17, %s2362_s26 }
  0x7f   : > { %p2371_p7 = scmp.lt.u32.totalorder %s2362_s26, %s3032_s10 }
  0x80   : > { %p2365_p2 = pnand %p2363_p0, %p2996_p8  ;;  %p2370_p3 = por %p2369_p11, %p2368_p10 }
  0x82   : > { %p2366_p9 = pneg %p2365_p2  ;;  %p2372_p5 = por %p2371_p7, %p2370_p3 }
  0x84   : > { %p2373_p12 = pnand %p2372_p5, %p2366_p9 }
  0x86   : > { %2376 = shalt.err (!%p2373_p12)
}
  0x87   : > { %s2377_s12 = scalar_lea.vmem %s666_s5, 16  ;;  %s2718_s25 = smov [#allocation12]  }
  0x88   : > { %p2378_p4 = scmp.ne.s32.totalorder %s666_s5, %s2377_s12  ;;  %s2382_s21 = sshll.u32 %s2718_s25, 4  ;;  %s2383_s21 = int_to_ptr.vmem [resolvable:$false] %s2382_s21 }
  0x89   : > { %s2384_s3 = scalar_lea.vmem %s2383_s21, 32  ;;  %p2385_p0 = scmp.lt.s32.totalorder %s666_s5, %s2383_s21 }
  0x8a   : > { %p2380_p1 = pnand %p2378_p4, %p2996_p8  ;;  %p2386_p2 = scmp.lt.s32.totalorder %s2384_s3, %s2377_s12 }
  0x8c   : > { %p2381_p13 = pneg %p2380_p1  ;;  %p2387_p6 = por %p2386_p2, %p2385_p0 }
  0x8e   : > { %p2388_p10 = pnand %p2387_p6, %p2381_p13 }
  0x90   : > { %2391 = shalt.err (!%p2388_p10)
}
  0x91   : > { %p3610_p11 = scmp.ne.s32.totalorder %s3597_s27, 0  ;;  %s3611_s11 = sld [smem:[#allocation52_spill]] }
  0x92   : > { %s700_s1 = scalar_lea.vmem [#allocation15], %s2963_s14  ;;  %s3550_s12 = scalar_lea.sflag [#allocation16], %s2929_s16 }
  0x93   : > { %2159 = dma.hbm_to_vmem [thread:$0]  (!%p3610_p11), %s3032_s10, 16, %s666_s5, %s3549_s28  }
  0x94   : > { %s707_s6 = sshll.u32 %s700_s1, 4  ;;  %s708_s6 = int_to_ptr.vmem [resolvable:$true] %s707_s6 }
  0x97   : > { %s3059_s17 = scalar_lea.hbm %s3611_s11, %s2970_s24  ;;  %s2397_s10 = scalar_lea.hbm %s3611_s11, 32 }
  0x98   : > { %s2392_s25 = scalar_lea.hbm %s3059_s17, 16  ;;  %p2398_p7 = scmp.lt.u32.totalorder %s3059_s17, %s3611_s11 }
  0x99   : > { %p2393_p6 = scmp.ne.s32.totalorder %s3059_s17, %s2392_s25  ;;  %p2399_p5 = scmp.lt.u32.totalorder %s2397_s10, %s2392_s25 }
  0x9a   : > { %p2401_p4 = scmp.lt.u32.totalorder %s2392_s25, %s3059_s17 }
  0x9b   : > { %p2395_p9 = pnand %p2393_p6, %p2996_p8  ;;  %p2400_p12 = por %p2399_p5, %p2398_p7 }
  0x9d   : > { %p2396_p3 = pneg %p2395_p9  ;;  %p2402_p1 = por %p2401_p4, %p2400_p12 }
  0x9f   : > { %p2403_p13 = pnand %p2402_p1, %p2396_p3 }
  0xa1   : > { %2406 = shalt.err (!%p2403_p13)
}
  0xa2   : > { %s2407_s18 = scalar_lea.vmem %s708_s6, 16  ;;  %s2719_s1 = smov [#allocation15]  }
  0xa3   : > { %p2408_p0 = scmp.ne.s32.totalorder %s708_s6, %s2407_s18  ;;  %s2412_s28 = sshll.u32 %s2719_s1, 4  ;;  %s2413_s28 = int_to_ptr.vmem [resolvable:$false] %s2412_s28 }
  0xa4   : > { %s2414_s21 = scalar_lea.vmem %s2413_s28, 32  ;;  %p2415_p6 = scmp.lt.s32.totalorder %s708_s6, %s2413_s28 }
  0xa5   : > { %p2410_p2 = pnand %p2408_p0, %p2996_p8  ;;  %p2416_p9 = scmp.lt.s32.totalorder %s2414_s21, %s2407_s18 }
  0xa7   : > { %p2411_p10 = pneg %p2410_p2  ;;  %p2417_p11 = por %p2416_p9, %p2415_p6 }
  0xa9   : > { %p2418_p5 = pnand %p2417_p11, %p2411_p10 }
  0xab   : > { %2421 = shalt.err (!%p2418_p5)
}
  0xac   : > { %p3612_p7 = scmp.ne.s32.totalorder %s3597_s27, 0  ;;  %s58_s28 = sadd.s32 1, %s2710_s22 }
  0xad   : > { %s65_s25 = sadd.s32 1, %s2694_s19  ;;  %p3613_p11 = scmp.ne.s32.totalorder %s3599_s4, 0 }
  0xae   : > { %2165 = dma.hbm_to_vmem [thread:$0]  (!%p3612_p7), %s3059_s17, 16, %s708_s6, %s3550_s12  }
  0xaf   : > { %s3682_s28 = smov (!%p3613_p11, %s58_s28), %s2710_s22  ;;  %p72_p3 = scmp.ne.s32.totalorder %s2694_s19, %s2690_s0 }
  0xb0   : > { %s3090_s5 = sand.u32 1, %s2694_s19   ;;  %p60_p12 = scmp.ge.s32.totalorder %s3682_s28, 2 }
  0xb1   : > { %p3614_p4 = scmp.eq.s32.totalorder %s2714_s2, 0  ;;  %p3615_p13 = scmp.eq.s32.totalorder %s2885_s23, 3 }
  0xb2   : > { %s3684_s28 = smov (%p60_p12, %s3682_s28), 0  ;;  %s1961_s17 = sshll.u32 %s3090_s5, 3 }
  0xb3   : > { %p74_p1 = por %p3614_p4, %p72_p3  ;;  %p3096_p0 = por %p3615_p13, %p72_p3 }
  0xb4   : > { %3617 = sst [smem:[#allocation39_spill]] %s3684_s28  ;;  %s1962_s4 = sshll.u32 %s2710_s22, 7 }
  0xb5   : > { %s3616_s10 = scalar_select %p3096_p0, 1, 0 }
  0xb6   : > { %s62_s6 = ssub.s32 %s2710_s22, %s3684_s28  ;;  %s3618_s18 = sld [smem:[#allocation41_spill]] }
  0xb7   : > { %p63_p2 = scmp.eq.s32.totalorder %s62_s6, 0  ;;  %s574_s21 = scalar_lea.vmem [#allocation3], %s1961_s17 }
  0xb8   : > { %s581_s12 = sshll.u32 %s574_s21, 4  ;;  %p3619_p10 = scmp.lt.s32.totalorder %s2714_s2, 4  ;;  %s3120_s12 = int_to_ptr.vmem [resolvable:$true] %s581_s12 }
  0xb9   : > { %s3118_s11 = scalar_select %p63_p2, %s2694_s19, %s65_s25  }
  0xba   : > { %p3113_p6 = pnand %p3619_p10, %p74_p1  ;;  %s571_s6 = scalar_lea.sflag [#allocation4], %s3090_s5 }
  0xbb   : > { %3621 = sst [smem:[#allocation40_spill]] %s3118_s11 }
  0xbc   : > { %s3109_s1 = scalar_lea.hbm %s3618_s18, %s1962_s4  ;;  %p2424_p5 = pneg %p3113_p6 }
  0xbd   : > { %s2422_s4 = scalar_lea.hbm %s3109_s1, 128  ;;  %s2427_s26 = scalar_lea.hbm %s3618_s18, 256 }
  0xbe   : > { %p2423_p9 = scmp.ne.s32.totalorder %s3109_s1, %s2422_s4  ;;  %p2428_p12 = scmp.lt.u32.totalorder %s3109_s1, %s3618_s18 }
  0xbf   : > { %p2429_p4 = scmp.lt.u32.totalorder %s2427_s26, %s2422_s4  ;;  %p2431_p13 = scmp.lt.u32.totalorder %s2422_s4, %s3109_s1 }
  0xc0   : > { %p2425_p11 = pnand %p2424_p5, %p2423_p9 }
  0xc1   : > { %p2430_p1 = por %p2429_p4, %p2428_p12 }
  0xc2   : > { %p2426_p3 = pneg %p2425_p11 }
  0xc3   : > { %p2432_p2 = por %p2431_p13, %p2430_p1 }
  0xc5   : > { %p2433_p10 = pnand %p2432_p2, %p2426_p3 }
  0xc7   : > { %2436 = shalt.err (!%p2433_p10)
}
  0xc8   : > { %s2437_s25 = scalar_lea.vmem %s3120_s12, 128  ;;  %s2720_s17 = smov [#allocation3]  }
  0xc9   : > { %p2438_p9 = scmp.ne.s32.totalorder %s3120_s12, %s2437_s25  ;;  %s2442_s3 = sshll.u32 %s2720_s17, 4  ;;  %s2443_s3 = int_to_ptr.vmem [resolvable:$false] %s2442_s3 }
  0xca   : > { %s2444_s28 = scalar_lea.vmem %s2443_s3, 256  ;;  %p2445_p7 = scmp.lt.s32.totalorder %s3120_s12, %s2443_s3 }
  0xcb   : > { %p2440_p11 = pnand %p2438_p9, %p2424_p5  ;;  %p2446_p12 = scmp.lt.s32.totalorder %s2444_s28, %s2437_s25 }
  0xcd   : > { %p2441_p0 = pneg %p2440_p11  ;;  %p2447_p4 = por %p2446_p12, %p2445_p7 }
  0xcf   : > { %p2448_p1 = pnand %p2447_p4, %p2441_p0 }
  0xd1   : > { %2451 = shalt.err (!%p2448_p1)
}
  0xd2   : > { %2147 = dma.hbm_to_vmem [thread:$0]  (!%p3113_p6), %s3109_s1, 128, %s3120_s12, %s571_s6  }
  0xd3   : > { %s1963_s4 = sshll.u32 %s2710_s22, 4  ;;  %s591_s26 = scalar_lea.vmem [#allocation6], %s3090_s5 }
  0xd4   : > { %s598_s21 = sshll.u32 %s591_s26, 4  ;;  %s3622_s11 = sld [smem:[#allocation42_spill]]  ;;  %s599_s21 = int_to_ptr.vmem [resolvable:$true] %s598_s21 }
  0xd5   : > { %s589_s25 = scalar_lea.sflag [#allocation7], %s2929_s16 }
  0xda   : > { %s3153_s3 = scalar_lea.hbm %s3622_s11, %s1963_s4  ;;  %s2457_s1 = scalar_lea.hbm %s3622_s11, 32 }
  0xdb   : > { %s2452_s28 = scalar_lea.hbm %s3153_s3, 16  ;;  %p2458_p13 = scmp.lt.u32.totalorder %s3153_s3, %s3622_s11 }
  0xdc   : > { %p2453_p7 = scmp.ne.s32.totalorder %s3153_s3, %s2452_s28  ;;  %p2459_p2 = scmp.lt.u32.totalorder %s2457_s1, %s2452_s28 }
  0xdd   : > { %p2461_p9 = scmp.lt.u32.totalorder %s2452_s28, %s3153_s3 }
  0xde   : > { %p2455_p0 = pnand %p2453_p7, %p2424_p5  ;;  %p2460_p10 = por %p2459_p2, %p2458_p13 }
  0xe0   : > { %p2456_p3 = pneg %p2455_p0  ;;  %p2462_p11 = por %p2461_p9, %p2460_p10 }
  0xe2   : > { %p2463_p12 = pnand %p2462_p11, %p2456_p3 }
  0xe4   : > { %2466 = shalt.err (!%p2463_p12)
}
  0xe5   : > { %s2467_s4 = scalar_lea.vmem %s599_s21, 16  ;;  %s2721_s26 = smov [#allocation6]  }
  0xe6   : > { %p2468_p4 = scmp.ne.s32.totalorder %s599_s21, %s2467_s4  ;;  %s2472_s17 = sshll.u32 %s2721_s26, 4  ;;  %s2473_s17 = int_to_ptr.vmem [resolvable:$false] %s2472_s17 }
  0xe7   : > { %s2474_s12 = scalar_lea.vmem %s2473_s17, 32  ;;  %p2475_p0 = scmp.lt.s32.totalorder %s599_s21, %s2473_s17 }
  0xe8   : > { %p2470_p1 = pnand %p2468_p4, %p2424_p5  ;;  %p2476_p8 = scmp.lt.s32.totalorder %s2474_s12, %s2467_s4 }
  0xea   : > { %p2471_p7 = pneg %p2470_p1  ;;  %p2477_p2 = por %p2476_p8, %p2475_p0 }
  0xec   : > { %p2478_p13 = pnand %p2477_p2, %p2471_p7 }
  0xee   : > { %2481 = shalt.err (!%p2478_p13)
}
  0xef   : > { %2150 = dma.hbm_to_vmem [thread:$0]  (!%p3113_p6), %s3153_s3, 16, %s599_s21, %s589_s25  }
  0xf0   : > { %s3623_s7 = sld [smem:[#allocation48_spill]]  ;;  %s641_s6 = scalar_lea.vmem [#allocation11], %s2963_s14 }
  0xf1   : > { %s648_s18 = sshll.u32 %s641_s6, 4  ;;  %s3624_s9 = sld [smem:[#allocation50_spill]]  ;;  %s649_s18 = int_to_ptr.vmem [resolvable:$true] %s648_s18 }
  0xf2   : > { %p3625_p6 = scmp.ne.s32.totalorder %s3604_s15, 0 }
  0xf6   : > { %s3179_s1 = scalar_lea.hbm %s3623_s7, %s2970_s24  ;;  %s2487_s25 = scalar_lea.hbm %s3623_s7, 32 }
  0xf7   : > { %s3186_s26 = scalar_lea.hbm %s3624_s9, %s2970_s24  ;;  %s2482_s17 = scalar_lea.hbm %s3179_s1, 16 }
  0xf8   : > { %p2483_p8 = scmp.ne.s32.totalorder %s3179_s1, %s2482_s17  ;;  %p2488_p10 = scmp.lt.u32.totalorder %s3179_s1, %s3623_s7 }
  0xf9   : > { %p2489_p9 = scmp.lt.u32.totalorder %s2487_s25, %s2482_s17  ;;  %p2491_p12 = scmp.lt.u32.totalorder %s2482_s17, %s3179_s1 }
  0xfa   : > { %p2485_p5 = pnand %p2483_p8, %p3625_p6 }
  0xfb   : > { %p2490_p11 = por %p2489_p9, %p2488_p10 }
  0xfc   : > { %p2486_p3 = pneg %p2485_p5 }
  0xfd   : > { %p2492_p4 = por %p2491_p12, %p2490_p11 }
  0xff   : > { %p2493_p1 = pnand %p2492_p4, %p2486_p3 }
 0x101   : > { %2496 = shalt.err (!%p2493_p1)
}
 0x102   : > { %s2497_s5 = scalar_lea.vmem %s649_s18, 16  ;;  %s2722_s6 = smov [#allocation11]  }
 0x103   : > { %p2498_p7 = scmp.ne.s32.totalorder %s649_s18, %s2497_s5  ;;  %s2502_s4 = sshll.u32 %s2722_s6, 4  ;;  %s2503_s4 = int_to_ptr.vmem [resolvable:$false] %s2502_s4 }
 0x104   : > { %s2504_s8 = scalar_lea.vmem %s2503_s4, 32  ;;  %p2505_p13 = scmp.lt.s32.totalorder %s649_s18, %s2503_s4 }
 0x105   : > { %p2500_p0 = pnand %p2498_p7, %p3625_p6  ;;  %p2506_p8 = scmp.lt.s32.totalorder %s2504_s8, %s2497_s5 }
 0x107   : > { %p2501_p2 = pneg %p2500_p0  ;;  %p2507_p5 = por %p2506_p8, %p2505_p13 }
 0x109   : > { %p2508_p9 = pnand %p2507_p5, %p2501_p2 }
 0x10b   : > { %2511 = shalt.err (!%p2508_p9)
}
 0x10c   : > { %p3626_p10 = scmp.ne.s32.totalorder %s3597_s27, 0  ;;  %s3627_s17 = scalar_lea.sflag [#allocation10], %s2929_s16 }
 0x10d   : > { %s675_s21 = scalar_lea.vmem [#allocation14], %s2963_s14  ;;  %s3628_s13 = sld [smem:[#allocation54_spill]] }
 0x10e   : > { %2156 = dma.hbm_to_vmem [thread:$0]  (!%p3626_p10), %s3179_s1, 16, %s649_s18, %s3627_s17  }
 0x10f   : > { %s682_s3 = sshll.u32 %s675_s21, 4  ;;  %s2512_s5 = scalar_lea.hbm %s3186_s26, 16  ;;  %s683_s3 = int_to_ptr.vmem [resolvable:$true] %s682_s3 }
 0x110   : > { %p2513_p3 = scmp.ne.s32.totalorder %s3186_s26, %s2512_s5  ;;  %s2517_s8 = scalar_lea.hbm %s3624_s9, 32 }
 0x111   : > { %p2518_p4 = scmp.lt.u32.totalorder %s3186_s26, %s3624_s9  ;;  %p2519_p1 = scmp.lt.u32.totalorder %s2517_s8, %s2512_s5 }
 0x112   : > { %p2515_p11 = pnand %p2513_p3, %p3625_p6  ;;  %p2521_p0 = scmp.lt.u32.totalorder %s2512_s5, %s3186_s26 }
 0x113   : > { %s3212_s28 = scalar_lea.hbm %s3628_s13, %s2970_s24  ;;  %p2520_p7 = por %p2519_p1, %p2518_p4 }
 0x114   : > { %p2516_p12 = pneg %p2515_p11 }
 0x115   : > { %p2522_p2 = por %p2521_p0, %p2520_p7 }
 0x117   : > { %p2523_p13 = pnand %p2522_p2, %p2516_p12 }
 0x119   : > { %2526 = shalt.err (!%p2523_p13)
}
 0x11a   : > { %s2527_s24 = scalar_lea.vmem %s683_s3, 16  ;;  %s2723_s1 = smov [#allocation14]  }
 0x11b   : > { %p2528_p8 = scmp.ne.s32.totalorder %s683_s3, %s2527_s24  ;;  %s2532_s18 = sshll.u32 %s2723_s1, 4  ;;  %s2533_s18 = int_to_ptr.vmem [resolvable:$false] %s2532_s18 }
 0x11c   : > { %s2534_s17 = scalar_lea.vmem %s2533_s18, 32  ;;  %p2535_p3 = scmp.lt.s32.totalorder %s683_s3, %s2533_s18 }
 0x11d   : > { %p2530_p5 = pnand %p2528_p8, %p3625_p6  ;;  %p2536_p11 = scmp.lt.s32.totalorder %s2534_s17, %s2527_s24 }
 0x11f   : > { %p2531_p9 = pneg %p2530_p5  ;;  %p2537_p10 = por %p2536_p11, %p2535_p3 }
 0x121   : > { %p2538_p1 = pnand %p2537_p10, %p2531_p9 }
 0x123   : > { %2541 = shalt.err (!%p2538_p1)
}
 0x124   : > { %p3629_p4 = scmp.ne.s32.totalorder %s3597_s27, 0  ;;  %s3630_s7 = scalar_lea.sflag [#allocation13], %s2929_s16 }
 0x125   : > { %s725_s11 = scalar_lea.vmem [#allocation17], %s2963_s14  ;;  %s2542_s25 = scalar_lea.hbm %s3212_s28, 16 }
 0x126   : > { %2162 = dma.hbm_to_vmem [thread:$0]  (!%p3629_p4), %s3186_s26, 16, %s683_s3, %s3630_s7  }
 0x127   : > { %s732_s21 = sshll.u32 %s725_s11, 4  ;;  %p2543_p12 = scmp.ne.s32.totalorder %s3212_s28, %s2542_s25  ;;  %s733_s21 = int_to_ptr.vmem [resolvable:$true] %s732_s21 }
 0x128   : > { %s2547_s6 = scalar_lea.hbm %s3628_s13, 32  ;;  %p2548_p0 = scmp.lt.u32.totalorder %s3212_s28, %s3628_s13 }
 0x129   : > { %p2545_p10 = pnand %p2543_p12, %p3625_p6  ;;  %p2549_p2 = scmp.lt.u32.totalorder %s2547_s6, %s2542_s25 }
 0x12a   : > { %p2551_p8 = scmp.lt.u32.totalorder %s2542_s25, %s3212_s28 }
 0x12b   : > { %p2546_p7 = pneg %p2545_p10  ;;  %p2550_p13 = por %p2549_p2, %p2548_p0 }
 0x12d   : > { %p2552_p5 = por %p2551_p8, %p2550_p13 }
 0x12f   : > { %p2553_p9 = pnand %p2552_p5, %p2546_p7 }
 0x131   : > { %2556 = shalt.err (!%p2553_p9)
}
 0x132   : > { %s2557_s14 = scalar_lea.vmem %s733_s21, 16  ;;  %s2724_s26 = smov [#allocation17]  }
 0x133   : > { %p2558_p3 = scmp.ne.s32.totalorder %s733_s21, %s2557_s14  ;;  %s2562_s3 = sshll.u32 %s2724_s26, 4  ;;  %s2563_s3 = int_to_ptr.vmem [resolvable:$false] %s2562_s3 }
 0x134   : > { %s2564_s24 = scalar_lea.vmem %s2563_s3, 32  ;;  %p2565_p12 = scmp.lt.s32.totalorder %s733_s21, %s2563_s3 }
 0x135   : > { %p2560_p11 = pnand %p2558_p3, %p3625_p6  ;;  %p2566_p10 = scmp.lt.s32.totalorder %s2564_s24, %s2557_s14 }
 0x137   : > { %p2561_p1 = pneg %p2560_p11  ;;  %p2567_p4 = por %p2566_p10, %p2565_p12 }
 0x139   : > { %p2568_p0 = pnand %p2567_p4, %p2561_p1 }
 0x13b   : > { %2571 = shalt.err (!%p2568_p0)
}
 0x13c   : > { %p3631_p2 = scmp.ne.s32.totalorder %s3597_s27, 0  ;;  %s3632_s1 = scalar_lea.sflag [#allocation16], %s2929_s16 }
 0x13d   : > { %p3633_p7 = scmp.ne.s32.totalorder %s3595_s30, 0 }
 0x13e   : > { %2168 = dma.hbm_to_vmem [thread:$0]  (!%p3631_p2), %s3212_s28, 16, %s733_s21, %s3632_s1  }
 0x13f   : > { %753 = sbr.rel (%p3633_p7) target bundleno = 3431 (0xd67), region = 92  ;;  %s3634_s15 = sld [smem:[#allocation34_spill]] (!%p3633_p7) }
 0x140   : > { %s3256_s18 = sand.u32 (!%p3633_p7), 1, %s2690_s0  }
 0x141   : > { %s3557_s17 = sshll.u32 (!%p3633_p7), %s3256_s18, 3  ;;  %s756_s7 = scalar_lea.sflag (!%p3633_p7), [#allocation4], %s3256_s18 }
 0x142   : > { %s3262_s11 = scalar_lea.vmem (!%p3633_p7), [#allocation3], %s3557_s17 }
 0x145   : > { %p3635_p6 = scmp.ne.s32.totalorder (!%p3633_p7), %s3634_s15, 0 }
 0x147   : > { %2645 = dma.done.wait (%p3635_p6), %s756_s7, 128  }
 0x148   : > { %2647 = vsyncadd (%p3635_p6), %s756_s7, 4294967168  ;;  %s764_s16 = sand.u32 1, %s2885_s23  }
 0x149   : > { %s765_s30 = scalar_lea.sflag [#allocation7], %s764_s16 }
 0x14a   : > { %2649 = dma.done.wait (%p3635_p6), %s765_s30, 16  }
 0x14b   : > { %2651 = vsyncadd (%p3635_p6), %s765_s30, 4294967280  ;;  %p3636_p4 = scmp.eq.s32.totalorder %s2885_s23, 0 }
 0x14d   : > { %2653 = dma.done.wait (%p3636_p4), [#allocation7], 16   ;;  %p3637_p13 = pmov %p3636_p4 }
 0x14e   : > { %s3638_s28 = sld [smem:[#allocation26_spill]]  ;;  %s3639_s21 = sld [smem:[#allocation35_spill]] }
 0x14f   : > { %2655 = vsyncadd (%p3637_p13), [#allocation7], 4294967280  ;;  %s777_s12 = scalar_lea.sflag [#allocation10], %s764_s16 }
 0x154   : > { %s3279_s25 = sand.u32 1, %s3638_s28   ;;  %p3640_p8 = scmp.ne.s32.totalorder %s3639_s21, 0 }
 0x156   : > { %2657 = dma.done.wait (%p3640_p8), %s777_s12, 32  }
 0x157   : > { %2659 = vsyncadd (%p3640_p8), %s777_s12, 4294967264  ;;  %s793_s4 = scalar_lea.sflag [#allocation13], %s764_s16 }
 0x158   : > { %2661 = dma.done.wait (%p3640_p8), %s793_s4, 32  }
 0x159   : > { %2663 = vsyncadd (%p3640_p8), %s793_s4, 4294967264  ;;  %s809_s14 = scalar_lea.sflag [#allocation16], %s764_s16 }
 0x15a   : > { %2665 = dma.done.wait (%p3640_p8), %s809_s14, 32  }
 0x15b   : > { %2667 = vsyncadd (%p3640_p8), %s809_s14, 4294967264  ;;  %s3641_s3 = sld [smem:[#allocation30_spill]]  ;;  %s3642_s30 = sld [smem:[#allocation45_spill]] }
 0x15c   : > { %s3643_s4 = sld [smem:[#allocation47_spill]]  ;;  %s3644_s8 = sld [smem:[#allocation51_spill]] }
 0x15d   : > { %s3645_s17 = sld [smem:[#allocation53_spill]]  ;;  %s3646_s7 = sld [smem:[#allocation55_spill]] }
 0x15e   : > { %s3647_s0 = sld [smem:[#allocation56_spill]]  ;;  %s819_s12 = scalar_lea.vmem [#allocation17], %s3279_s25 }
 0x161   : > { %p926_p5 = scmp.lt.s32.totalorder %s3641_s3, 1  ;;  %p1982_p9 = scmp.ne.s32.totalorder %s3641_s3, 0 }
 0x162   : > { %v957_v0 = vld [vmem:[%s3262_s11] sm:$0xff] (!%p1982_p9)  ;;  %vm960_vm0 = vcmask (!%p1982_p9), 261120   ;;  %s3649_s19 = sld [smem:[#allocation43_spill]] (!%p1982_p9)  ;;  %v1984_v13 = vld [vmem:[#allocation8] ss:$0 sm:$0xff] (!%p1982_p9) }
 0x163   : > { %s3300_s24 = scalar_select %p926_p5, %s3641_s3, 1 }
 0x164   : > { %956 = sbr.rel (%p1982_p9) target bundleno = 670 (0x29e), region = 132  ;;  %v961_v1 = vsel (!%p1982_p9), %vm960_vm0, %v957_v0, 0.0 }
 0x165   : > { %s2021_s1 = sshll.u32 %s3300_s24, 4  ;;  %s2024_s15 = sshll.u32 %s3300_s24, 5  ;;  %962 = vadd.xlane.f32.xlu0 (!%p1982_p9), %v961_v1 }
 0x166   : > { %s3307_s28 = scalar_lea.vmem %s3642_s30, %s2021_s1  ;;  %s3312_s14 = scalar_lea.vmem %s3643_s4, %s2021_s1 }
 0x167   : > { %s3317_s6 = scalar_lea.vmem %s3644_s8, %s2021_s1  ;;  %s3322_s9 = scalar_lea.vmem %s3645_s17, %s2024_s15 }
 0x168   : > { %s948_s16 = scalar_lea.vmem %s3646_s7, %s3300_s24  ;;  %s951_s21 = scalar_lea.vmem %s3647_s0, %s3300_s24  ;;  %v1983_v11 = vld [vmem:[%s3649_s19] ss:$0 sm:$0xff] (!%p1982_p9) }
 0x169   : > { %s3648_s4 = sshll.u32 %s3256_s18, 3 }
 0x16a   : > { %s3335_s20 = scalar_lea.vmem [#allocation18], %s3648_s4 }
 0x1f2   : > { %v963_v2 = vpop.xlane.xlu0 %962 }
 0x1f3   : > { %v965_v3 = vmul.f32 0.03125, %v963_v2 }
 0x1f5   : > { %v966_v4 = vsub.f32 %v957_v0, %v965_v3 }
 0x1f7   : > { %v967_v5 = vmul.f32 %v966_v4, %v966_v4 }
 0x1f9   : > { %v968_v6 = vsel %vm960_vm0, %v967_v5, 0.0 }
 0x1fa   : > { %969 = vadd.xlane.f32.xlu0 %v968_v6 }
 0x287   : > { %v970_v7 = vpop.xlane.xlu0 %969 }
 0x288   : > { %v971_v8 = vmul.f32 0.03125, %v970_v7 }
 0x28a   : > { %v972_v9 = vadd.f32 1e-12, %v971_v8 }
 0x28c   : > { %2276 = vrsqrt.f32 %v972_v9 }
 0x296   : > { %v2277_v10 = vpop.eup %2276 }
 0x297   : > { %v974_v12 = vmul.f32 %v2277_v10, %v966_v4 }
 0x299   : > { %v981_v14 = vmul.f32 %v1983_v11, %v974_v12 }
 0x29b   : > { %v988_v15 = vadd.f32 %v1984_v13, %v981_v14 }
 0x29d   : > { %989 = vst.msk [vmem:[#allocation2] sm:$0xff] %vm960_vm0, %v988_v15 }
 0x29e PF: > { %v2278_v16 = vld [vmem:[%s3307_s28] sm:$0xff]   ;;  %v2725_v17 = vmov 0.0   ;;  %v2279_v18 = vld [vmem:[%s3307_s28 + $0x8] sm:$0xff]   ;;  %vm2726_vm1 = vmmov 0   ;;  %vm1016_vm2 = vcmask 261120   ;;  %s3650_s22 = scalar_lea.vmem [#allocation9], %s3279_s25 }
 0x29f   : > { %2050 = vmatprep.subr.bf16.mxu0 %v2725_v17  ;;  %2058 = vmatprep.subr.bf16.mxu1 %v2725_v17  ;;  %v1985_v21 = vld [vmem:[%s3650_s22] ss:$0 sm:$0xff]  ;;  %s2727_s17 = smov 112   ;;  %s2728_s11 = smov 96   ;;  %vm1070_vm3 = vcmask 130048   ;;  %vm1117_vm4 = vcmask 64512  }
 0x2a0   : > { %2051 = vmatpush3.bf16.msra.mxu0 %v2278_v16  ;;  %2054 = vmatprep.mubr.msk.bf16.mxu0 %vm2726_vm1, %v2725_v17  ;;  %s2729_s27 = smov 80   ;;  %s3651_s5 = scalar_lea.vmem [#allocation6], %s3256_s18  ;;  %vm1135_vm5 = vcmask 1043456   ;;  %v2280_v4 = vld [vmem:[%s3312_s14] sm:$0xff]   ;;  %v2281_v5 = vld [vmem:[%s3312_s14 + $0x8] sm:$0xff]   ;;  %vm1508_vm6 = vcmask 523264  }
 0x2a1   : > { %2052 = vmatprep.subr.bf16.mxu0 %v2725_v17  ;;  %2060 = vmatprep.mubr.msk.bf16.mxu1 %vm2726_vm1, %v2725_v17  ;;  %v1989_v33 = vld [vmem:[%s3651_s5] ss:$0 sm:$0xff]  ;;  %s2730_s8 = smov 64   ;;  %s2731_s23 = smov 48  }
 0x2a2   : > { %s2732_s26 = smov 16   ;;  %s3652_s3 = scalar_lea.vmem [#allocation11], %s3279_s25 }
 0x2a3   : > { %s3653_s1 = scalar_lea.vmem [#allocation12], %s3279_s25  ;;  %s3654_s15 = scalar_lea.vmem [#allocation14], %s3279_s25 }
 0x2a4   : > { %v3351_v19 = vld [vmem:[#allocation2] sm:$0xff]  ;;  %2053 = vmatpush3.bf16.msra.mxu0 %v2279_v18 }
 0x2a5   : > { %v992_v20 = vpack.c.bf16 %v3351_v19, %v3351_v19  ;;  %2064 = vmatprep.subr.bf16.mxu0 %v2725_v17  ;;  %v1994_v18 = vld [vmem:[%s3652_s3] ss:$0 sm:$0xff] }
 0x2a7   : > { %2055 = vmatmul.mubr.msk.bf16.vlgmr.msra.gmra.mrb[0].mxu0 %vm1016_vm2, %v992_v20 }
 0x2a8   : > { %2066 = vmatprep.mubr.msk.bf16.mxu0 %vm2726_vm1, %v2725_v17 }
 0x37a   : > { %v1054_v22 = vpop.f32.mrb[0].mxu0 }
 0x37b   : > { %v1055_v23 = vadd.f32 %v1985_v21, %v1054_v22  ;;  %v2056_v24 = vpop.f32.mrb[1].mxu0 }
 0x37c   : > { %v1057_v25 = vpop.f32.mrb[2].mxu0 }
 0x37d   : > { %v1060_v26 = vpack.c.bf16 %v1055_v23, %v1055_v23  ;;  %v2057_v27 = vpop.f32.mrb[3].mxu0 }
 0x37f   : > { %1179 = vrot.lane.b32.xlu1 %v1060_v26, %s2727_s17  ;;  %1068 = vrot.lane.b32.xlu0 %v1060_v26, %s2728_s11 }
 0x383   : > { %1181 = vrot.lane.b32.xlu0 %v1060_v26, %s2729_s27 }
 0x3f1   : > { %v1069_v28 = vpop.permute.xlu0 %1068  ;;  %v1180_v32 = vpop.permute.xlu1 %1179 }
 0x3f2   : > { %v1075_v29 = vsel %vm1070_vm3, %v1069_v28, 0 }
 0x3f3   : > { %2059 = vmatpush3.bf16.xpose.msra.mxu1 %v1075_v29 }
 0x3f4   : > { %2070 = vmatprep.subr.bf16.mxu1 %v2725_v17 }
 0x3f5   : > { %v1182_v30 = vpop.permute.xlu0 %1181 }
 0x3f6   : > { %v1187_v31 = vsel %vm1070_vm3, %v1182_v30, 0 }
 0x3fa   : > { %2061 = vmatmul.mubr.msk.bf16.vlgmr.msra.gmra.mrb[0].mxu1 %vm1070_vm3, %v1060_v26 }
 0x3fb   : > { %2071 = vmatpush3.bf16.xpose.msra.mxu1 %v1187_v31  ;;  %2072 = vmatprep.mubr.msk.bf16.mxu1 %vm2726_vm1, %v2725_v17 }
 0x3fc   : > { %2082 = vmatprep.subr.bf16.mxu1 %v2725_v17 }
 0x402   : > { %2073 = vmatmul.mubr.msk.bf16.vlgmr.msra.gmra.mrb[4].mxu1 %vm1070_vm3, %v1180_v32  ;;  %v2282_v32 = vld [vmem:[%s3317_s6] sm:$0xff]  }
 0x403   : > { %2086 = vmatprep.mubr.msk.bf16.mxu1 %vm2726_vm1, %v2725_v17  ;;  %2083 = vmatpush3.bf16.msra.mxu1 %v2280_v4 }
 0x404   : > { %2084 = vmatprep.subr.bf16.mxu1 %v2725_v17 }
 0x407   : > { %2085 = vmatpush3.bf16.msra.mxu1 %v2281_v5 }
 0x408   : > { %2098 = vmatprep.subr.bf16.mxu1 %v2725_v17 }
 0x4cd   : > { %v1111_v34 = vpop.f32.mrb[0].mxu1 }
 0x4ce   : > { %v1112_v35 = vadd.f32 %v1989_v33, %v1111_v34  ;;  %v2062_v36 = vpop.f32.mrb[1].mxu1 }
 0x4cf   : > { %v1114_v37 = vpop.f32.mrb[2].mxu1 }
 0x4d0   : > { %v2063_v38 = vpop.f32.mrb[3].mxu1  ;;  %v1118_v39 = vsel %vm1117_vm4, %v1112_v35, -inf  ;;  %v1998_v37 = vld [vmem:[%s3653_s1] ss:$0 sm:$0xff] }
 0x4d1   : > { %1119 = vmax.xlane.f32.xlu1 %v1118_v39  ;;  %v1999_v39 = vld [vmem:[%s3654_s15] ss:$0 sm:$0xff] }
 0x4d5   : > { %v1223_v40 = vpop.f32.mrb[4].mxu1 }
 0x4d6   : > { %v1224_v41 = vadd.f32 %v1989_v33, %v1223_v40  ;;  %v2074_v42 = vpop.f32.mrb[5].mxu1  ;;  %v2283_v33 = vld [vmem:[%s3317_s6 + $0x8] sm:$0xff]   ;;  %s3655_s6 = scalar_lea.vmem [#allocation15], %s3279_s25 }
 0x4d7   : > { %v1226_v43 = vpop.f32.mrb[6].mxu1 }
 0x4d8   : > { %v2075_v44 = vpop.f32.mrb[7].mxu1  ;;  %v1229_v45 = vsel %vm1117_vm4, %v1224_v41, -inf  ;;  %v2284_v43 = vld [vmem:[%s3322_s9] sm:$0xff]  }
 0x4d9   : > { %1230 = vmax.xlane.f32.xlu0 %v1229_v45  ;;  %v2285_v44 = vld [vmem:[%s3322_s9 + $0x8] sm:$0xff]   ;;  %v2286_v45 = vld [vmem:[%s3322_s9 + $0x10] sm:$0xff]  }
 0x55e   : > { %v1120_v46 = vpop.xlane.xlu1 %1119 }
 0x55f   : > { %v1121_v47 = vsub.f32 %v1112_v35, %v1120_v46  ;;  %v2287_v46 = vld [vmem:[%s3322_s9 + $0x18] sm:$0xff]  }
 0x561   : > { %v1122_v48 = vmul.f32 1.442695, %v1121_v47  ;;  %v2000_v47 = vld [vmem:[%s3655_s6] ss:$0 sm:$0xff] }
 0x563   : > { %2288 = vpow2.f32 %v1122_v48 }
 0x566   : > { %v1231_v49 = vpop.xlane.xlu0 %1230 }
 0x567   : > { %v1232_v50 = vsub.f32 %v1224_v41, %v1231_v49 }
 0x569   : > { %v1233_v51 = vmul.f32 1.442695, %v1232_v50 }
 0x56b   : > { %2290 = vpow2.f32 %v1233_v51 }
 0x56d   : > { %v2289_v52 = vpop.eup %2288 }
 0x56e   : > { %v1124_v53 = vsel %vm1117_vm4, %v2289_v52, 0.0 }
 0x56f   : > { %1125 = vadd.xlane.f32.xlu0 %v1124_v53 }
 0x575   : > { %v2291_v54 = vpop.eup %2290 }
 0x576   : > { %v1235_v55 = vsel %vm1117_vm4, %v2291_v54, 0.0 }
 0x577   : > { %1236 = vadd.xlane.f32.xlu1 %v1235_v55 }
 0x585   : > { %1130 = vrot.lane.b32.xlu0 %v1060_v26, %s2730_s8 }
 0x588   : > { %1241 = vrot.lane.b32.xlu1 %v1060_v26, %s2731_s23 }
 0x5fc   : > { %v1126_v56 = vpop.xlane.xlu0 %1125 }
 0x5fd   : > { %2292 = vrcp.f32 %v1126_v56 }
 0x600   : > { %v1131_v57 = vpop.permute.xlu0 %1130 }
 0x601   : > { %v1137_v58 = vsel %vm1135_vm5, %v1131_v57, 0 }
 0x602   : > { %2065 = vmatpush3.bf16.msra.mxu0 %v1137_v58 }
 0x603   : > { %2076 = vmatprep.subr.bf16.mxu0 %v2725_v17 }
 0x604   : > { %v1237_v59 = vpop.xlane.xlu1 %1236 }
 0x605   : > { %2294 = vrcp.f32 %v1237_v59 }
 0x607   : > { %v2293_v60 = vpop.eup %2292 }
 0x608   : > { %v1128_v61 = vmul.f32 %v2293_v60, %v2289_v52  ;;  %v1242_v62 = vpop.permute.xlu1 %1241 }
 0x609   : > { %v1247_v0 = vsel %vm1135_vm5, %v1242_v62, 0  ;;  %v2004_v62 = vld [vmem:[%s819_s12] ss:$0 sm:$0xff]  ;;  %s3658_s12 = sld [smem:[#allocation30_spill]] }
 0x60a   : > { %v1129_v63 = vpack.c.bf16 %v1128_v61, %v1128_v61 }
 0x60c   : > { %2067 = vmatmul.mubr.msk.bf16.vlgmr.msra.gmra.mrb[4].mxu0 %vm1117_vm4, %v1129_v63 }
 0x60d   : > { %2077 = vmatpush3.bf16.msra.mxu0 %v1247_v0  ;;  %2078 = vmatprep.mubr.msk.bf16.mxu0 %vm2726_vm1, %v2725_v17 }
 0x60e   : > { %2090 = vmatprep.subr.bf16.mxu0 %v2725_v17 }
 0x60f   : > { %v2295_v1 = vpop.eup %2294  ;;  %p2012_p3 = scmp.ne.s32.totalorder %s3658_s12, 1 }
 0x610   : > { %v1239_v2 = vmul.f32 %v2295_v1, %v2291_v54  ;;  %s3659_s0 = sld [smem:[#allocation57_spill]] (!%p2012_p3)  ;;  %vm2734_vm7 = vmmov (!%p2012_p3), 0   ;;  %s3661_s22 = sld [smem:[#allocation58_spill]] (!%p2012_p3) }
 0x612   : > { %v1240_v3 = vpack.c.bf16 %v1239_v2, %v1239_v2 }
 0x614   : > { %2079 = vmatmul.mubr.msk.bf16.vlgmr.msra.gmra.mrb[8].mxu0 %vm1117_vm4, %v1240_v3 }
 0x615   : > { %2094 = vmatprep.mubr.msk.bf16.mxu0 %vm2726_vm1, %v2725_v17  ;;  %2091 = vmatpush3.bf16.msra.mxu0 %v2282_v32 }
 0x616   : > { %2092 = vmatprep.subr.bf16.mxu0 %v2725_v17  ;;  %s3660_s17 = smov (!%p2012_p3), %s3659_s0 }
 0x619   : > { %2093 = vmatpush3.bf16.msra.mxu0 %v2283_v33 }
 0x6df   : > { %v1173_v6 = vpop.f32.mrb[4].mxu0 }
 0x6e0   : > { %v2068_v7 = vpop.f32.mrb[5].mxu0 }
 0x6e1   : > { %v1176_v8 = vpop.f32.mrb[6].mxu0 }
 0x6e2   : > { %v2069_v9 = vpop.f32.mrb[7].mxu0 }
 0x6e7   : > { %v1283_v10 = vpop.f32.mrb[8].mxu0 }
 0x6e8   : > { %1290 = vrot.lane.b32.xlu1 %v1283_v10, %s2732_s26  ;;  %v2080_v11 = vpop.f32.mrb[9].mxu0 }
 0x6e9   : > { %v1286_v12 = vpop.f32.mrb[10].mxu0 }
 0x6ea   : > { %v2081_v13 = vpop.f32.mrb[11].mxu0 }
 0x75a   : > { %v1291_v14 = vpop.permute.xlu1 %1290 }
 0x75b   : > { %v1293_v15 = vsel %vm1070_vm3, %v1173_v6, %v1291_v14 }
 0x75c   : > { %v1294_v16 = vpack.c.bf16 %v1293_v15, %v1293_v15  ;;  %v2010_v15 = vld [vmem:[%s948_s16] ss:$0 sm:$0xff] }
 0x75e   : > { %2087 = vmatmul.mubr.msk.bf16.vlgmr.msra.gmra.mrb[8].mxu1 %vm1016_vm2, %v1294_v16 }
 0x75f   : > { %2106 = vmatprep.mubr.msk.bf16.mxu1 %vm2726_vm1, %v2725_v17  ;;  %2099 = vmatpush3.bf16.msra.mxu1 %v2284_v43 }
 0x760   : > { %2100 = vmatprep.subr.bf16.mxu1 %v2725_v17 }
 0x763   : > { %2101 = vmatpush3.bf16.msra.mxu1 %v2285_v44 }
 0x764   : > { %2102 = vmatprep.subr.bf16.mxu1 %v2725_v17 }
 0x767   : > { %2103 = vmatpush3.bf16.msra.mxu1 %v2286_v45 }
 0x768   : > { %2104 = vmatprep.subr.bf16.mxu1 %v2725_v17 }
 0x76b   : > { %2105 = vmatpush3.bf16.msra.mxu1 %v2287_v46 }
 0x831   : > { %v1355_v20 = vpop.f32.mrb[8].mxu1 }
 0x832   : > { %v1356_v21 = vadd.f32 %v1994_v18, %v1355_v20  ;;  %v2088_v22 = vpop.f32.mrb[9].mxu1  ;;  %v2011_v18 = vld [vmem:[%s951_s21] ss:$0 sm:$0xff] }
 0x833   : > { %v1358_v23 = vpop.f32.mrb[10].mxu1  ;;  %v2302_v22 = vld [vmem:[%s3659_s0] sm:$0xff] (!%p2012_p3)  }
 0x834   : > { %v2089_v24 = vpop.f32.mrb[11].mxu1  ;;  %v1361_v25 = vadd.f32 %v1356_v21, %v3351_v19  ;;  %v2733_v23 = vmov (!%p2012_p3), 0.0  }
 0x835   : > { %2110 = vmatprep.subr.bf16.mxu0 (!%p2012_p3), %v2733_v23  ;;  %v2303_v24 = vld [vmem:[%s3660_s17 + $0x8] sm:$0xff] (!%p2012_p3)  }
 0x836   : > { %v1364_v26 = vsel %vm1016_vm2, %v1361_v25, 0.0 }
 0x837   : > { %1365 = vadd.xlane.f32.xlu0 %v1364_v26  ;;  %v2013_v26 = vld [vmem:[%s3661_s22] ss:$0 sm:$0xff] (!%p2012_p3) }
 0x8c4   : > { %v1366_v27 = vpop.xlane.xlu0 %1365 }
 0x8c5   : > { %v1368_v28 = vmul.f32 0.03125, %v1366_v27 }
 0x8c7   : > { %v1369_v29 = vsub.f32 %v1361_v25, %v1368_v28 }
 0x8c9   : > { %v1370_v30 = vmul.f32 %v1369_v29, %v1369_v29 }
 0x8cb   : > { %v1371_v31 = vsel %vm1016_vm2, %v1370_v30, 0.0 }
 0x8cc   : > { %1372 = vadd.xlane.f32.xlu1 %v1371_v31 }
 0x959   : > { %v1373_v19 = vpop.xlane.xlu1 %1372 }
 0x95a   : > { %v1374_v34 = vmul.f32 0.03125, %v1373_v19 }
 0x95c   : > { %v1375_v35 = vadd.f32 1e-12, %v1374_v34 }
 0x95e   : > { %2296 = vrsqrt.f32 %v1375_v35 }
 0x968   : > { %v2297_v36 = vpop.eup %2296 }
 0x969   : > { %v1377_v38 = vmul.f32 %v2297_v36, %v1369_v29 }
 0x96b   : > { %v1384_v40 = vmul.f32 %v1998_v37, %v1377_v38 }
 0x96d   : > { %v1391_v41 = vadd.f32 %v1999_v39, %v1384_v40 }
 0x96f   : > { %v1392_v42 = vpack.c.bf16 %v1391_v41, %v1391_v41 }
 0x971   : > { %2095 = vmatmul.mubr.msk.bf16.vlgmr.msra.gmra.mrb[12].mxu0 %vm1016_vm2, %v1392_v42 }
 0x972   : > { %2111 = vmatpush3.bf16.msra.mxu0 (!%p2012_p3), %v2302_v22  ;;  %2114 = vmatprep.mubr.msk.bf16.mxu0 (!%p2012_p3), %vm2734_vm7, %v2733_v23 }
 0x973   : > { %2112 = vmatprep.subr.bf16.mxu0 (!%p2012_p3), %v2733_v23 }
 0x976   : > { %2113 = vmatpush3.bf16.msra.mxu0 (!%p2012_p3), %v2303_v24 }
 0xa44   : > { %v1453_v48 = vpop.f32.mrb[12].mxu0 }
 0xa45   : > { %v1454_v49 = vadd.f32 %v2000_v47, %v1453_v48  ;;  %v2096_v50 = vpop.f32.mrb[13].mxu0 }
 0xa46   : > { %v1456_v51 = vpop.f32.mrb[14].mxu0 }
 0xa47   : > { %v1460_v52 = vmul.f32 0.044715, %v1454_v49  ;;  %v2097_v53 = vpop.f32.mrb[15].mxu0  ;;  %v1459_v59 = vmul.f32 0.5, %v1454_v49 }
 0xa49   : > { %v1461_v54 = vmul.f32 %v1460_v52, %v1454_v49 }
 0xa4b   : > { %v1462_v55 = vmul.f32 %v1461_v54, %v1454_v49 }
 0xa4d   : > { %v1463_v56 = vadd.f32 %v1462_v55, %v1454_v49 }
 0xa4f   : > { %v1464_v57 = vmul.f32 0.7978846, %v1463_v56 }
 0xa51   : > { %2298 = vtanh.f32 %v1464_v57 }
 0xa5b   : > { %v2299_v58 = vpop.eup %2298 }
 0xa5c   : > { %v1466_v60 = vadd.f32 1.0, %v2299_v58 }
 0xa5e   : > { %v1467_v61 = vmul.f32 %v1466_v60, %v1459_v59 }
 0xa60   : > { %v1468_v17 = vpack.c.bf16 %v1467_v61, %v1467_v61 }
 0xa62   : > { %2107 = vmatmul.mubr.msk.bf16.vlgmr.msra.gmra.mrb[12].mxu1 %vm1508_vm6, %v1468_v17 }
 0xb35   : > { %v1546_v63 = vpop.f32.mrb[12].mxu1 }
 0xb36   : > { %v1547_v0 = vadd.f32 %v2004_v62, %v1546_v63  ;;  %v2108_v1 = vpop.f32.mrb[13].mxu1 }
 0xb37   : > { %v1549_v2 = vpop.f32.mrb[14].mxu1 }
 0xb38   : > { %v2109_v3 = vpop.f32.mrb[15].mxu1  ;;  %v1552_v4 = vadd.f32 %v1547_v0, %v1391_v41 }
 0xb3a   : > { %v1555_v5 = vsel %vm1016_vm2, %v1552_v4, 0.0 }
 0xb3b   : > { %1556 = vadd.xlane.f32.xlu0 %v1555_v5 }
 0xbc8   : > { %v1557_v6 = vpop.xlane.xlu0 %1556 }
 0xbc9   : > { %v1558_v7 = vmul.f32 0.03125, %v1557_v6 }
 0xbcb   : > { %v1559_v8 = vsub.f32 %v1552_v4, %v1558_v7 }
 0xbcd   : > { %v1560_v9 = vmul.f32 %v1559_v8, %v1559_v8 }
 0xbcf   : > { %v1561_v10 = vsel %vm1016_vm2, %v1560_v9, 0.0 }
 0xbd0   : > { %1562 = vadd.xlane.f32.xlu0 %v1561_v10 }
 0xc5d   : > { %v1563_v11 = vpop.xlane.xlu0 %1562 }
 0xc5e   : > { %v1564_v12 = vmul.f32 0.03125, %v1563_v11 }
 0xc60   : > { %v1565_v13 = vadd.f32 1e-12, %v1564_v12 }
 0xc62   : > { %2300 = vrsqrt.f32 %v1565_v13 }
 0xc6c   : > { %v2301_v14 = vpop.eup %2300 }
 0xc6d   : > { %v1567_v16 = vmul.f32 %v2301_v14, %v1559_v8  ;;  %1586 = sbr.rel (%p2012_p3) target bundleno = 3404 (0xd4c), region = 136 }
 0xc6f   : > { %v1574_v20 = vmul.f32 %v2010_v15, %v1567_v16 }
 0xc71   : > { %v1581_v21 = vadd.f32 %v2011_v18, %v1574_v20 }
 0xc73   : > { %1582 = vst.msk [vmem:[#allocation2] sm:$0xff] %vm1016_vm2, %v1581_v21  ;;  %v1587_v25 = vpack.c.bf16 (!%p2012_p3), %v1581_v21, %v1581_v21 }
 0xc75   : > { %2115 = vmatmul.mubr.msk.bf16.vlgmr.msra.gmra.mrb[0].mxu0 %vm1016_vm2, %v1587_v25 }
 0xd48   : > { %v1648_v27 = vpop.f32.mrb[0].mxu0 }
 0xd49   : > { %v1649_v28 = vadd.f32 %v2013_v26, %v1648_v27  ;;  %v2116_v29 = vpop.f32.mrb[1].mxu0 }
 0xd4a   : > { %v1651_v30 = vpop.f32.mrb[2].mxu0 }
 0xd4b   : > { %1654 = vst [vmem:[%s3335_s20] sm:$0xff] %v1649_v28  ;;  %v2117_v31 = vpop.f32.mrb[3].mxu0 }
 0xd4c PF: > { %s3662_s11 = sld [smem:[#allocation31_spill]]  ;;  %s3663_s23 = sld [smem:[#allocation59_spill]] }
 0xd4d   : > { %s1669_s3 = sshll.u32 %s3335_s20, 4  ;;  %s1656_s1 = scalar_lea.sflag [#allocation5], %s3256_s18  ;;  %s1670_s3 = int_to_ptr.vmem [resolvable:$true] %s1669_s3 }
 0xd4e   : > { %s2572_s15 = scalar_lea.vmem %s1670_s3, 128  ;;  %p3664_p1 = scmp.ne.s32.totalorder %s3616_s10, 0 }
 0xd4f   : > { %p2573_p11 = scmp.ne.s32.totalorder %s1670_s3, %s2572_s15  ;;  %s2735_s6 = smov [#allocation18]  }
 0xd50   : > { %s2576_s9 = sshll.u32 %s2735_s6, 4  ;;  %s2577_s9 = int_to_ptr.vmem [resolvable:$false] %s2576_s9 }
 0xd51   : > { %p2574_p12 = pnand %p2573_p11, %p3664_p1  ;;  %s2578_s25 = scalar_lea.vmem %s2577_s9, 256 }
 0xd52   : > { %s2018_s27 = sshll.u32 %s3662_s11, 7  ;;  %p2579_p0 = scmp.lt.s32.totalorder %s1670_s3, %s2577_s9 }
 0xd53   : > { %s3449_s26 = scalar_lea.hbm %s3663_s23, %s2018_s27  ;;  %p2575_p10 = pneg %p2574_p12 }
 0xd54   : > { %p2580_p2 = scmp.lt.s32.totalorder %s2578_s25, %s2572_s15 }
 0xd56   : > { %p2581_p7 = por %p2580_p2, %p2579_p0 }
 0xd58   : > { %p2582_p6 = pnand %p2581_p7, %p2575_p10 }
 0xd5a   : > { %2585 = shalt.err (!%p2582_p6)
}
 0xd5b   : > { %s2586_s20 = scalar_lea.hbm %s3449_s26, 128  ;;  %s2590_s14 = scalar_lea.hbm %s3663_s23, 256 }
 0xd5c   : > { %p2587_p4 = scmp.ne.s32.totalorder %s3449_s26, %s2586_s20  ;;  %p2591_p5 = scmp.lt.u32.totalorder %s3449_s26, %s3663_s23 }
 0xd5d   : > { %p2592_p9 = scmp.lt.u32.totalorder %s2590_s14, %s2586_s20  ;;  %p2594_p11 = scmp.lt.u32.totalorder %s2586_s20, %s3449_s26 }
 0xd5e   : > { %p2588_p13 = pnand %p2587_p4, %p3664_p1 }
 0xd5f   : > { %p2593_p3 = por %p2592_p9, %p2591_p5 }
 0xd60   : > { %p2589_p8 = pneg %p2588_p13 }
 0xd61   : > { %p2595_p12 = por %p2594_p11, %p2593_p3 }
 0xd63   : > { %p2596_p10 = pnand %p2595_p12, %p2589_p8 }
 0xd65   : > { %2599 = shalt.err (!%p2596_p10)
}
 0xd66   : > { %2138 = dma.vmem_to_hbm [thread:$0]  (%p3664_p1), %s1670_s3, 128, %s3449_s26, %s1656_s1  }
 0xd67 PF: > { %s3665_s12 = sld [smem:[#allocation27_spill]]  ;;  %s3666_s4 = sld [smem:[#allocation36_spill]] }
 0xd68   : > { %p2176_p0 = scmp.ge.s32.totalorder %s2714_s2, 2 }
 0xd6d   : > { %s1681_s13 = sand.u32 1, %s3665_s12   ;;  %p3667_p2 = scmp.ne.s32.totalorder %s3666_s4, 0 }
 0xd6e   : > { %s1682_s0 = scalar_lea.sflag [#allocation5], %s1681_s13 }
 0xd6f   : > { %p2170_p7 = pnand %p2176_p0, %p3667_p2 }
 0xd71   : > { %2669 = dma.done.wait (!%p2170_p7), %s1682_s0, 128  }
 0xd72   : > { %2671 = vsyncadd (!%p2170_p7), %s1682_s0, 4294967168  ;;  %s46_s2 = sadd.s32 1, %s2714_s2   ;;  %s3668_s27 = sld [smem:[#allocation26_spill]] }
 0xd73   : > { %p43_p6 = scmp.ge.s32.totalorder %s46_s2, 6   ;;  %s3669_s16 = sld [smem:[#allocation38_spill]] }
 0xd74   : > { %s3670_s30 = sld [smem:[#allocation28_spill]]  ;;  %s3671_s0 = sld [smem:[#allocation29_spill]] }
 0xd75   : > { %s3672_s19 = sld [smem:[#allocation40_spill]]  ;;  %s3673_s1 = sld [smem:[#allocation32_spill]] }
 0xd76   : > { %s3674_s20 = sld [smem:[#allocation33_spill]]  ;;  %s3675_s21 = sld [smem:[#allocation37_spill]] }
 0xd77   : > { %s3676_s22 = sld [smem:[#allocation39_spill]]  ;;  %s3677_s28 = smov %s2682_s29 }
 0xd78   :  { %45 = sbr.rel (!%p43_p6) target bundleno = 37 (0x25), region = 252 }
 0xd79   : > { %s3678_s29 = smov %s3669_s16 }
 0xd7f   :  { %1687 = vsyncpa [#allocation4], 1 }
 0xd80   :  { %1689 = vsyncpa [#allocation4 + $0x1], 1 }
 0xd81   :  { %1690 = vsyncpa [#allocation7], 1 }
 0xd82   :  { %1692 = vsyncpa [#allocation7 + $0x1], 1 }
 0xd83   :  { %1693 = vsyncpa [#allocation10], 1 }
 0xd84   :  { %1695 = vsyncpa [#allocation10 + $0x1], 1 }
 0xd85   :  { %1696 = vsyncpa [#allocation13], 1 }
 0xd86   :  { %1698 = vsyncpa [#allocation13 + $0x1], 1 }
 0xd87   :  { %1699 = vsyncpa [#allocation16], 1 }
 0xd88   :  { %1701 = vsyncpa [#allocation16 + $0x1], 1 }
 0xd89   :  { %1702 = vsyncpa [#allocation5], 1 }
 0xd8a   :  { %1704 = vsyncpa [#allocation5 + $0x1], 1 }

</bundles_post_ra>
